<compile_context>
chip_gen: v7x
topology: tpu7x:2x2x1
jax: 0.10.0
libtpu: 0.0.40
codegen_flags: <defaults>
</compile_context>

<pallas_src>
import functools

import numpy as np
import jax
import jax.numpy as jnp
from jax.experimental import pallas as pl
from jax.experimental.pallas import tpu as pltpu


# ----------------------------- fused Pallas kernel ---------------------------
def _dwsep_kernel(xs_ref, wd_ref, bd_ref, wp_ref, bp_ref, o_ref, dw_ref,
                  *, Nb, C, Ho, Wo):
    """Depthwise 4x4/s2/p1 conv (VPU, f32) + pointwise 1x1 conv (MXU, bf16)."""
    j = pl.program_id(1)  # Cout-tile index ("arbitrary" axis, sequential per core)

    # ---- depthwise: 16 aligned taps over all Nb batch elements, f32, computed
    #      once per batch block and cached in VMEM scratch for reuse across j ----
    @pl.when(j == 0)
    def _():
        wdall = wd_ref[...]                      # (16, C) f32 — single aligned load
        bd = bdall = bd_ref[...]                 # (1, C) f32
        acc = jnp.zeros((Nb, Ho, Wo, C), jnp.float32)
        for kh in range(4):
            a, r = divmod(kh, 2)
            for kw in range(4):
                b, s = divmod(kw, 2)
                p = 4 * b + 2 * r + s            # pre-shifted phase: W slice at offset 0
                tap = xs_ref[:, p, a:a + Ho, 0:Wo, :]        # (Nb, Ho, Wo, C) f32
                t = kh * 4 + kw
                acc = acc + tap * wdall[t:t + 1, :]          # vreg slice + broadcast
        dw = acc + bd                            # depthwise bias, f32
        dw_ref[...] = dw.reshape(Nb * Ho * Wo, C).astype(dw_ref.dtype)

    # ---- pointwise 1x1 conv == (Nb*Ho*Wo, C) x (C, TN) matmul on the MXU ----
    y = jnp.dot(dw_ref[...], wp_ref[...], preferred_element_type=jnp.float32)
    o_ref[...] = (y + bp_ref[...]).astype(o_ref.dtype)


# -------------------------------- param prep ---------------------------------
def prepare_params(wd, bd, wp, bp):
    """Hoist PyTorch-layout -> kernel-layout relayout + padding (done once).

    wd: (C, 1, 4, 4) depthwise weight, bd: (C,)
    wp: (Cout, C, 1, 1) pointwise weight, bp: (Cout,)
    """
    C = wd.shape[0]
    Cout = wp.shape[0]
    Cout_pad = ((Cout + 127) // 128) * 128                     # lane-dense output
    wd_k = jnp.transpose(wd.reshape(C, 16), (1, 0)).astype(jnp.float32)   # (16, C)
    bd_k = bd.reshape(1, C).astype(jnp.float32)
    wp_full = jnp.transpose(wp.reshape(Cout, C), (1, 0)).astype(jnp.bfloat16)
    wp_k = jnp.pad(wp_full, ((0, 0), (0, Cout_pad - Cout)))               # (C, Cout_pad)
    bp_k = jnp.pad(bp.astype(jnp.float32), (0, Cout_pad - Cout)).reshape(1, Cout_pad)
    return dict(wd=wd_k, bd=bd_k, wp=wp_k, bp=bp_k, cout=int(Cout))


# ------------------------------ tiling heuristic ------------------------------
def _pick_batch_tile(N, Ho, Wo, Hp2, Wp2, C, m_target=256, vmem_cap=4 << 20):
    """Nb = batch elements per grid step. Targets M = Nb*Ho*Wo >= m_target to fill
    the MXU / amortize step overhead, caps the xs block by a VMEM budget, and
    prefers keeping >= 2 steps on the parallel batch axis (v7x: 2 TensorCores)
    as long as that does not starve M below ~128."""
    ho_wo = Ho * Wo

    def vmem_ok(d):
        return d * 8 * Hp2 * Wp2 * C * 4 <= vmem_cap

    divs = [d for d in range(1, N + 1) if N % d == 0 and vmem_ok(d)]
    fits = [d for d in divs if d * ho_wo <= max(m_target, ho_wo)]
    nb = max(fits) if fits else 1
    half = [d for d in fits if N // d >= 2]
    if half and max(half) * ho_wo >= 128:
        nb = max(half)
    return nb


# --------------------------------- forward -----------------------------------
def _dwsep_impl(x_nhwc, wd_k, bd_k, wp_k, bp_k, cout):
    """NHWC core. Returns (N, Ho, Wo, cout) f32."""
    N, H, W, C = x_nhwc.shape
    assert H % 2 == 0 and W % 2 == 0, "k=4/s=2/p=1 path assumes even H, W"
    Cout_pad = wp_k.shape[1]
    Ho, Wo = H // 2, W // 2
    Hp2, Wp2 = Ho + 1, Wo + 1

    # Pad H by (1,1) and W by (1,3): the 2 extra columns let us materialize a
    # W-shifted copy of every stride-2 phase, so all 16 in-kernel tap slices
    # start at sublane offset 0.  Input stays f32 (no per-tap casts in-kernel).
    #   xs[n, 4b+2r+s, i, j, c] == x_pad[n, 2i+r, 2j+s+2b, c]
    xp = jnp.pad(x_nhwc, ((0, 0), (1, 1), (1, 3), (0, 0)))
    v = jnp.stack([xp[:, :, 0:W + 2, :], xp[:, :, 2:W + 4, :]], axis=1)
    v = v.reshape(N, 2, Hp2, 2, Wp2, 2, C)
    xs = jnp.transpose(v, (0, 1, 3, 5, 2, 4, 6)).reshape(N, 8, Hp2, Wp2, C)

    Nb = _pick_batch_tile(N, Ho, Wo, Hp2, Wp2, C)
    TN = 256 if Cout_pad % 256 == 0 else 128
    grid = (N // Nb, Cout_pad // TN)
    M = Nb * Ho * Wo

    out = pl.pallas_call(
        functools.partial(_dwsep_kernel, Nb=Nb, C=C, Ho=Ho, Wo=Wo),
        out_shape=jax.ShapeDtypeStruct((N * Ho * Wo, Cout_pad), jnp.float32),
        grid=grid,
        in_specs=[
            # Nb batch elements x 8 pre-shifted stride-2 phases, resident in VMEM;
            # same block across j -> not re-DMA'd per Cout tile.
            pl.BlockSpec((Nb, 8, Hp2, Wp2, C), lambda n, j: (n, 0, 0, 0, 0)),
            pl.BlockSpec((16, C), lambda n, j: (0, 0)),        # depthwise weight
            pl.BlockSpec((1, C), lambda n, j: (0, 0)),         # depthwise bias
            pl.BlockSpec((C, TN), lambda n, j: (0, j)),        # pointwise weight
            pl.BlockSpec((1, TN), lambda n, j: (0, j)),        # pointwise bias
        ],
        out_specs=pl.BlockSpec((M, TN), lambda n, j: (n, j)),  # lane-dense output
        scratch_shapes=[pltpu.VMEM((M, C), jnp.bfloat16)],     # cached depthwise lhs
        compiler_params=pltpu.CompilerParams(
            # batch axis parallel (v7x megacore); Cout-tile axis must be
            # sequential because the depthwise scratch is reused across it.
            dimension_semantics=("parallel", "arbitrary")),
    )(xs, wd_k, bd_k, wp_k, bp_k)

    out = out.reshape(N, Ho, Wo, Cout_pad)
    if Cout_pad != cout:
        out = out[..., :cout]
    return out


@functools.partial(jax.jit, static_argnames=("cout",))
def depthwise_separable_conv_nhwc(x_nhwc, wd_k, bd_k, wp_k, bp_k, *, cout):
    """NHWC-in / NHWC-out entry point (preferred: no NCHW<->NHWC relayout)."""
    return _dwsep_impl(x_nhwc, wd_k, bd_k, wp_k, bp_k, cout)


@functools.partial(jax.jit, static_argnames=("cout",))
def _forward_nchw(x_nchw, wd_k, bd_k, wp_k, bp_k, *, cout):
    x = jnp.transpose(x_nchw, (0, 2, 3, 1))
    y = _dwsep_impl(x, wd_k, bd_k, wp_k, bp_k, cout)
    return jnp.transpose(y, (0, 3, 1, 2))


def depthwise_separable_conv(x_nchw, params):
    """PyTorch-compatible forward: NCHW in, NCHW out."""
    return _forward_nchw(x_nchw, params["wd"], params["bd"], params["wp"],
                         params["bp"], cout=params["cout"])


# ----------------------------------- reference --------------------------------
def reference_forward(x, wd, bd, wp, bp):
    """Pure-XLA f32 reference matching the PyTorch module."""
    C = x.shape[1]
    y = jax.lax.conv_general_dilated(
        x, wd, window_strides=(2, 2), padding=((1, 1), (1, 1)),
        dimension_numbers=("NCHW", "OIHW", "NCHW"),
        feature_group_count=C, precision=jax.lax.Precision.HIGHEST)
    y = y + bd.reshape(1, -1, 1, 1)
    y = jax.lax.conv_general_dilated(
        y, wp, window_strides=(1, 1), padding=((0, 0), (0, 0)),
        dimension_numbers=("NCHW", "OIHW", "NCHW"),
        precision=jax.lax.Precision.HIGHEST)
    return y + bp.reshape(1, -1, 1, 1)


if __name__ == "__main__":
    # Small shapes; Cout=96 deliberately exercises the Cout->128 lane padding.
    N, C, Cout, H, W = 8, 64, 96, 16, 16
    key = jax.random.PRNGKey(0)
    k_x, k_wd, k_bd, k_wp, k_bp = jax.random.split(key, 5)
    x = jax.random.normal(k_x, (N, C, H, W), jnp.float32)
    wd = 0.1 * jax.random.normal(k_wd, (C, 1, 4, 4), jnp.float32)      # depthwise
    bd = 0.1 * jax.random.normal(k_bd, (C,), jnp.float32)
    wp = 0.1 * jax.random.normal(k_wp, (Cout, C, 1, 1), jnp.float32)   # pointwise
    bp = 0.1 * jax.random.normal(k_bp, (Cout,), jnp.float32)

    params = prepare_params(wd, bd, wp, bp)
    out = jax.block_until_ready(depthwise_separable_conv(x, params))
    assert out.shape == (N, Cout, H // 2, W // 2), out.shape

    ref = jax.block_until_ready(reference_forward(x, wd, bd, wp, bp))
    np.testing.assert_allclose(np.asarray(out), np.asarray(ref),
                               rtol=2e-2, atol=2e-2)
    print("KERNEL_OK")
</pallas_src>

<mosaic_0001>
module attributes {stable_mosaic.version = 11 : i64} {
  func.func @_dwsep_kernel(%arg0: i32, %arg1: i32, %arg2: memref<4x8x9x9x64xf32, #tpu.memory_space<vmem>>, %arg3: memref<16x64xf32, #tpu.memory_space<vmem>>, %arg4: memref<1x64xf32, #tpu.memory_space<vmem>>, %arg5: memref<64x128xbf16, #tpu.memory_space<vmem>>, %arg6: memref<1x128xf32, #tpu.memory_space<vmem>>, %arg7: memref<256x128xf32, #tpu.memory_space<vmem>>, %arg8: memref<256x64xbf16, #tpu.memory_space<vmem>>) attributes {dimension_semantics = [#tpu.dimension_semantics<parallel>, #tpu.dimension_semantics<arbitrary>], iteration_bounds = array<i64: 2, 1>, scalar_prefetch = 0 : i64, scratch_operands = 1 : i64, tpu.core_type = #tpu.core_type<tc>, window_params = [{transform_indices = @transform_0, window_bounds = array<i64: 4, 8, 9, 9, 64>}, {pipeline_mode = #tpu.pipeline_mode<synchronous>, transform_indices = @transform_1, window_bounds = array<i64: 16, 64>}, {pipeline_mode = #tpu.pipeline_mode<synchronous>, transform_indices = @transform_2, window_bounds = array<i64: 1, 64>}, {transform_indices = @transform_3, window_bounds = array<i64: 64, 128>}, {transform_indices = @transform_4, window_bounds = array<i64: 1, 128>}, {transform_indices = @transform_5, window_bounds = array<i64: 256, 128>}]} {
    %c0_i32 = arith.constant 0 : i32
    %0 = arith.cmpi eq, %arg1, %c0_i32 : i32
    %1 = arith.extui %0 : i1 to i32
    %c0_i32_0 = arith.constant 0 : i32
    %2 = arith.cmpi ne, %1, %c0_i32_0 : i32
    scf.if %2 {
      %c0_8 = arith.constant 0 : index
      %c0_9 = arith.constant 0 : index
      %10 = vector.load %arg3[%c0_8, %c0_9] : memref<16x64xf32, #tpu.memory_space<vmem>>, vector<16x64xf32>
      %c0_10 = arith.constant 0 : index
      %c0_11 = arith.constant 0 : index
      %11 = vector.load %arg4[%c0_10, %c0_11] : memref<1x64xf32, #tpu.memory_space<vmem>>, vector<1x64xf32>
      %cst_12 = arith.constant 0.000000e+00 : f32
      %12 = vector.broadcast %cst_12 : f32 to vector<4x8x8x64xf32>
      %c0_13 = arith.constant 0 : index
      %c0_14 = arith.constant 0 : index
      %c0_15 = arith.constant 0 : index
      %c0_16 = arith.constant 0 : index
      %c0_17 = arith.constant 0 : index
      %13 = vector.load %arg2[%c0_13, %c0_14, %c0_15, %c0_16, %c0_17] : memref<4x8x9x9x64xf32, #tpu.memory_space<vmem>>, vector<4x1x8x8x64xf32>
      %14 = vector.shape_cast %13 : vector<4x1x8x8x64xf32> to vector<4x8x8x64xf32>
      %15 = vector.extract_strided_slice %10 {offsets = [0, 0], sizes = [1, 64], strides = [1, 1]} : vector<16x64xf32> to vector<1x64xf32>
      %16 = vector.shape_cast %15 : vector<1x64xf32> to vector<1x1x1x64xf32>
      %17 = vector.broadcast %16 : vector<1x1x1x64xf32> to vector<4x8x8x64xf32>
      %18 = arith.mulf %14, %17 : vector<4x8x8x64xf32>
      %19 = arith.addf %12, %18 : vector<4x8x8x64xf32>
      %c0_18 = arith.constant 0 : index
      %c1 = arith.constant 1 : index
      %c0_19 = arith.constant 0 : index
      %c0_20 = arith.constant 0 : index
      %c0_21 = arith.constant 0 : index
      %20 = vector.load %arg2[%c0_18, %c1, %c0_19, %c0_20, %c0_21] : memref<4x8x9x9x64xf32, #tpu.memory_space<vmem>>, vector<4x1x8x8x64xf32>
      %21 = vector.shape_cast %20 : vector<4x1x8x8x64xf32> to vector<4x8x8x64xf32>
      %22 = vector.extract_strided_slice %10 {offsets = [1, 0], sizes = [1, 64], strides = [1, 1]} : vector<16x64xf32> to vector<1x64xf32>
      %23 = vector.shape_cast %22 : vector<1x64xf32> to vector<1x1x1x64xf32>
      %24 = vector.broadcast %23 : vector<1x1x1x64xf32> to vector<4x8x8x64xf32>
      %25 = arith.mulf %21, %24 : vector<4x8x8x64xf32>
      %26 = arith.addf %19, %25 : vector<4x8x8x64xf32>
      %c0_22 = arith.constant 0 : index
      %c4 = arith.constant 4 : index
      %c0_23 = arith.constant 0 : index
      %c0_24 = arith.constant 0 : index
      %c0_25 = arith.constant 0 : index
      %27 = vector.load %arg2[%c0_22, %c4, %c0_23, %c0_24, %c0_25] : memref<4x8x9x9x64xf32, #tpu.memory_space<vmem>>, vector<4x1x8x8x64xf32>
      %28 = vector.shape_cast %27 : vector<4x1x8x8x64xf32> to vector<4x8x8x64xf32>
      %29 = vector.extract_strided_slice %10 {offsets = [2, 0], sizes = [1, 64], strides = [1, 1]} : vector<16x64xf32> to vector<1x64xf32>
      %30 = vector.shape_cast %29 : vector<1x64xf32> to vector<1x1x1x64xf32>
      %31 = vector.broadcast %30 : vector<1x1x1x64xf32> to vector<4x8x8x64xf32>
      %32 = arith.mulf %28, %31 : vector<4x8x8x64xf32>
      %33 = arith.addf %26, %32 : vector<4x8x8x64xf32>
      %c0_26 = arith.constant 0 : index
      %c5 = arith.constant 5 : index
      %c0_27 = arith.constant 0 : index
      %c0_28 = arith.constant 0 : index
      %c0_29 = arith.constant 0 : index
      %34 = vector.load %arg2[%c0_26, %c5, %c0_27, %c0_28, %c0_29] : memref<4x8x9x9x64xf32, #tpu.memory_space<vmem>>, vector<4x1x8x8x64xf32>
      %35 = vector.shape_cast %34 : vector<4x1x8x8x64xf32> to vector<4x8x8x64xf32>
      %36 = vector.extract_strided_slice %10 {offsets = [3, 0], sizes = [1, 64], strides = [1, 1]} : vector<16x64xf32> to vector<1x64xf32>
      %37 = vector.shape_cast %36 : vector<1x64xf32> to vector<1x1x1x64xf32>
      %38 = vector.broadcast %37 : vector<1x1x1x64xf32> to vector<4x8x8x64xf32>
      %39 = arith.mulf %35, %38 : vector<4x8x8x64xf32>
      %40 = arith.addf %33, %39 : vector<4x8x8x64xf32>
      %c0_30 = arith.constant 0 : index
      %c2 = arith.constant 2 : index
      %c0_31 = arith.constant 0 : index
      %c0_32 = arith.constant 0 : index
      %c0_33 = arith.constant 0 : index
      %41 = vector.load %arg2[%c0_30, %c2, %c0_31, %c0_32, %c0_33] : memref<4x8x9x9x64xf32, #tpu.memory_space<vmem>>, vector<4x1x8x8x64xf32>
      %42 = vector.shape_cast %41 : vector<4x1x8x8x64xf32> to vector<4x8x8x64xf32>
      %43 = vector.extract_strided_slice %10 {offsets = [4, 0], sizes = [1, 64], strides = [1, 1]} : vector<16x64xf32> to vector<1x64xf32>
      %44 = vector.shape_cast %43 : vector<1x64xf32> to vector<1x1x1x64xf32>
      %45 = vector.broadcast %44 : vector<1x1x1x64xf32> to vector<4x8x8x64xf32>
      %46 = arith.mulf %42, %45 : vector<4x8x8x64xf32>
      %47 = arith.addf %40, %46 : vector<4x8x8x64xf32>
      %c0_34 = arith.constant 0 : index
      %c3 = arith.constant 3 : index
      %c0_35 = arith.constant 0 : index
      %c0_36 = arith.constant 0 : index
      %c0_37 = arith.constant 0 : index
      %48 = vector.load %arg2[%c0_34, %c3, %c0_35, %c0_36, %c0_37] : memref<4x8x9x9x64xf32, #tpu.memory_space<vmem>>, vector<4x1x8x8x64xf32>
      %49 = vector.shape_cast %48 : vector<4x1x8x8x64xf32> to vector<4x8x8x64xf32>
      %50 = vector.extract_strided_slice %10 {offsets = [5, 0], sizes = [1, 64], strides = [1, 1]} : vector<16x64xf32> to vector<1x64xf32>
      %51 = vector.shape_cast %50 : vector<1x64xf32> to vector<1x1x1x64xf32>
      %52 = vector.broadcast %51 : vector<1x1x1x64xf32> to vector<4x8x8x64xf32>
      %53 = arith.mulf %49, %52 : vector<4x8x8x64xf32>
      %54 = arith.addf %47, %53 : vector<4x8x8x64xf32>
      %c0_38 = arith.constant 0 : index
      %c6 = arith.constant 6 : index
      %c0_39 = arith.constant 0 : index
      %c0_40 = arith.constant 0 : index
      %c0_41 = arith.constant 0 : index
      %55 = vector.load %arg2[%c0_38, %c6, %c0_39, %c0_40, %c0_41] : memref<4x8x9x9x64xf32, #tpu.memory_space<vmem>>, vector<4x1x8x8x64xf32>
      %56 = vector.shape_cast %55 : vector<4x1x8x8x64xf32> to vector<4x8x8x64xf32>
      %57 = vector.extract_strided_slice %10 {offsets = [6, 0], sizes = [1, 64], strides = [1, 1]} : vector<16x64xf32> to vector<1x64xf32>
      %58 = vector.shape_cast %57 : vector<1x64xf32> to vector<1x1x1x64xf32>
      %59 = vector.broadcast %58 : vector<1x1x1x64xf32> to vector<4x8x8x64xf32>
      %60 = arith.mulf %56, %59 : vector<4x8x8x64xf32>
      %61 = arith.addf %54, %60 : vector<4x8x8x64xf32>
      %c0_42 = arith.constant 0 : index
      %c7 = arith.constant 7 : index
      %c0_43 = arith.constant 0 : index
      %c0_44 = arith.constant 0 : index
      %c0_45 = arith.constant 0 : index
      %62 = vector.load %arg2[%c0_42, %c7, %c0_43, %c0_44, %c0_45] : memref<4x8x9x9x64xf32, #tpu.memory_space<vmem>>, vector<4x1x8x8x64xf32>
      %63 = vector.shape_cast %62 : vector<4x1x8x8x64xf32> to vector<4x8x8x64xf32>
      %64 = vector.extract_strided_slice %10 {offsets = [7, 0], sizes = [1, 64], strides = [1, 1]} : vector<16x64xf32> to vector<1x64xf32>
      %65 = vector.shape_cast %64 : vector<1x64xf32> to vector<1x1x1x64xf32>
      %66 = vector.broadcast %65 : vector<1x1x1x64xf32> to vector<4x8x8x64xf32>
      %67 = arith.mulf %63, %66 : vector<4x8x8x64xf32>
      %68 = arith.addf %61, %67 : vector<4x8x8x64xf32>
      %c0_46 = arith.constant 0 : index
      %c0_47 = arith.constant 0 : index
      %c1_48 = arith.constant 1 : index
      %c0_49 = arith.constant 0 : index
      %c0_50 = arith.constant 0 : index
      %69 = vector.load %arg2[%c0_46, %c0_47, %c1_48, %c0_49, %c0_50] : memref<4x8x9x9x64xf32, #tpu.memory_space<vmem>>, vector<4x1x8x8x64xf32>
      %70 = vector.shape_cast %69 : vector<4x1x8x8x64xf32> to vector<4x8x8x64xf32>
      %71 = vector.extract_strided_slice %10 {offsets = [8, 0], sizes = [1, 64], strides = [1, 1]} : vector<16x64xf32> to vector<1x64xf32>
      %72 = vector.shape_cast %71 : vector<1x64xf32> to vector<1x1x1x64xf32>
      %73 = vector.broadcast %72 : vector<1x1x1x64xf32> to vector<4x8x8x64xf32>
      %74 = arith.mulf %70, %73 : vector<4x8x8x64xf32>
      %75 = arith.addf %68, %74 : vector<4x8x8x64xf32>
      %c0_51 = arith.constant 0 : index
      %c1_52 = arith.constant 1 : index
      %c1_53 = arith.constant 1 : index
      %c0_54 = arith.constant 0 : index
      %c0_55 = arith.constant 0 : index
      %76 = vector.load %arg2[%c0_51, %c1_52, %c1_53, %c0_54, %c0_55] : memref<4x8x9x9x64xf32, #tpu.memory_space<vmem>>, vector<4x1x8x8x64xf32>
      %77 = vector.shape_cast %76 : vector<4x1x8x8x64xf32> to vector<4x8x8x64xf32>
      %78 = vector.extract_strided_slice %10 {offsets = [9, 0], sizes = [1, 64], strides = [1, 1]} : vector<16x64xf32> to vector<1x64xf32>
      %79 = vector.shape_cast %78 : vector<1x64xf32> to vector<1x1x1x64xf32>
      %80 = vector.broadcast %79 : vector<1x1x1x64xf32> to vector<4x8x8x64xf32>
      %81 = arith.mulf %77, %80 : vector<4x8x8x64xf32>
      %82 = arith.addf %75, %81 : vector<4x8x8x64xf32>
      %c0_56 = arith.constant 0 : index
      %c4_57 = arith.constant 4 : index
      %c1_58 = arith.constant 1 : index
      %c0_59 = arith.constant 0 : index
      %c0_60 = arith.constant 0 : index
      %83 = vector.load %arg2[%c0_56, %c4_57, %c1_58, %c0_59, %c0_60] : memref<4x8x9x9x64xf32, #tpu.memory_space<vmem>>, vector<4x1x8x8x64xf32>
      %84 = vector.shape_cast %83 : vector<4x1x8x8x64xf32> to vector<4x8x8x64xf32>
      %85 = vector.extract_strided_slice %10 {offsets = [10, 0], sizes = [1, 64], strides = [1, 1]} : vector<16x64xf32> to vector<1x64xf32>
      %86 = vector.shape_cast %85 : vector<1x64xf32> to vector<1x1x1x64xf32>
      %87 = vector.broadcast %86 : vector<1x1x1x64xf32> to vector<4x8x8x64xf32>
      %88 = arith.mulf %84, %87 : vector<4x8x8x64xf32>
      %89 = arith.addf %82, %88 : vector<4x8x8x64xf32>
      %c0_61 = arith.constant 0 : index
      %c5_62 = arith.constant 5 : index
      %c1_63 = arith.constant 1 : index
      %c0_64 = arith.constant 0 : index
      %c0_65 = arith.constant 0 : index
      %90 = vector.load %arg2[%c0_61, %c5_62, %c1_63, %c0_64, %c0_65] : memref<4x8x9x9x64xf32, #tpu.memory_space<vmem>>, vector<4x1x8x8x64xf32>
      %91 = vector.shape_cast %90 : vector<4x1x8x8x64xf32> to vector<4x8x8x64xf32>
      %92 = vector.extract_strided_slice %10 {offsets = [11, 0], sizes = [1, 64], strides = [1, 1]} : vector<16x64xf32> to vector<1x64xf32>
      %93 = vector.shape_cast %92 : vector<1x64xf32> to vector<1x1x1x64xf32>
      %94 = vector.broadcast %93 : vector<1x1x1x64xf32> to vector<4x8x8x64xf32>
      %95 = arith.mulf %91, %94 : vector<4x8x8x64xf32>
      %96 = arith.addf %89, %95 : vector<4x8x8x64xf32>
      %c0_66 = arith.constant 0 : index
      %c2_67 = arith.constant 2 : index
      %c1_68 = arith.constant 1 : index
      %c0_69 = arith.constant 0 : index
      %c0_70 = arith.constant 0 : index
      %97 = vector.load %arg2[%c0_66, %c2_67, %c1_68, %c0_69, %c0_70] : memref<4x8x9x9x64xf32, #tpu.memory_space<vmem>>, vector<4x1x8x8x64xf32>
      %98 = vector.shape_cast %97 : vector<4x1x8x8x64xf32> to vector<4x8x8x64xf32>
      %99 = vector.extract_strided_slice %10 {offsets = [12, 0], sizes = [1, 64], strides = [1, 1]} : vector<16x64xf32> to vector<1x64xf32>
      %100 = vector.shape_cast %99 : vector<1x64xf32> to vector<1x1x1x64xf32>
      %101 = vector.broadcast %100 : vector<1x1x1x64xf32> to vector<4x8x8x64xf32>
      %102 = arith.mulf %98, %101 : vector<4x8x8x64xf32>
      %103 = arith.addf %96, %102 : vector<4x8x8x64xf32>
      %c0_71 = arith.constant 0 : index
      %c3_72 = arith.constant 3 : index
      %c1_73 = arith.constant 1 : index
      %c0_74 = arith.constant 0 : index
      %c0_75 = arith.constant 0 : index
      %104 = vector.load %arg2[%c0_71, %c3_72, %c1_73, %c0_74, %c0_75] : memref<4x8x9x9x64xf32, #tpu.memory_space<vmem>>, vector<4x1x8x8x64xf32>
      %105 = vector.shape_cast %104 : vector<4x1x8x8x64xf32> to vector<4x8x8x64xf32>
      %106 = vector.extract_strided_slice %10 {offsets = [13, 0], sizes = [1, 64], strides = [1, 1]} : vector<16x64xf32> to vector<1x64xf32>
      %107 = vector.shape_cast %106 : vector<1x64xf32> to vector<1x1x1x64xf32>
      %108 = vector.broadcast %107 : vector<1x1x1x64xf32> to vector<4x8x8x64xf32>
      %109 = arith.mulf %105, %108 : vector<4x8x8x64xf32>
      %110 = arith.addf %103, %109 : vector<4x8x8x64xf32>
      %c0_76 = arith.constant 0 : index
      %c6_77 = arith.constant 6 : index
      %c1_78 = arith.constant 1 : index
      %c0_79 = arith.constant 0 : index
      %c0_80 = arith.constant 0 : index
      %111 = vector.load %arg2[%c0_76, %c6_77, %c1_78, %c0_79, %c0_80] : memref<4x8x9x9x64xf32, #tpu.memory_space<vmem>>, vector<4x1x8x8x64xf32>
      %112 = vector.shape_cast %111 : vector<4x1x8x8x64xf32> to vector<4x8x8x64xf32>
      %113 = vector.extract_strided_slice %10 {offsets = [14, 0], sizes = [1, 64], strides = [1, 1]} : vector<16x64xf32> to vector<1x64xf32>
      %114 = vector.shape_cast %113 : vector<1x64xf32> to vector<1x1x1x64xf32>
      %115 = vector.broadcast %114 : vector<1x1x1x64xf32> to vector<4x8x8x64xf32>
      %116 = arith.mulf %112, %115 : vector<4x8x8x64xf32>
      %117 = arith.addf %110, %116 : vector<4x8x8x64xf32>
      %c0_81 = arith.constant 0 : index
      %c7_82 = arith.constant 7 : index
      %c1_83 = arith.constant 1 : index
      %c0_84 = arith.constant 0 : index
      %c0_85 = arith.constant 0 : index
      %118 = vector.load %arg2[%c0_81, %c7_82, %c1_83, %c0_84, %c0_85] : memref<4x8x9x9x64xf32, #tpu.memory_space<vmem>>, vector<4x1x8x8x64xf32>
      %119 = vector.shape_cast %118 : vector<4x1x8x8x64xf32> to vector<4x8x8x64xf32>
      %120 = vector.extract_strided_slice %10 {offsets = [15, 0], sizes = [1, 64], strides = [1, 1]} : vector<16x64xf32> to vector<1x64xf32>
      %121 = vector.shape_cast %120 : vector<1x64xf32> to vector<1x1x1x64xf32>
      %122 = vector.broadcast %121 : vector<1x1x1x64xf32> to vector<4x8x8x64xf32>
      %123 = arith.mulf %119, %122 : vector<4x8x8x64xf32>
      %124 = arith.addf %117, %123 : vector<4x8x8x64xf32>
      %125 = vector.shape_cast %11 : vector<1x64xf32> to vector<1x1x1x64xf32>
      %126 = vector.broadcast %125 : vector<1x1x1x64xf32> to vector<4x8x8x64xf32>
      %127 = arith.addf %124, %126 : vector<4x8x8x64xf32>
      %128 = vector.shape_cast %127 : vector<4x8x8x64xf32> to vector<256x64xf32>
      %129 = arith.truncf %128 : vector<256x64xf32> to vector<256x64xbf16>
      %c0_86 = arith.constant 0 : index
      %c0_87 = arith.constant 0 : index
      %130 = vector.load %arg8[%c0_86, %c0_87] : memref<256x64xbf16, #tpu.memory_space<vmem>>, vector<256x64xbf16>
      tpu.vector_store %arg8[%c0_86, %c0_87], %129 {strides = array<i32>} : memref<256x64xbf16, #tpu.memory_space<vmem>>, vector<256x64xbf16>,
    } else {
    }
    %c0 = arith.constant 0 : index
    %c0_1 = arith.constant 0 : index
    %3 = vector.load %arg8[%c0, %c0_1] : memref<256x64xbf16, #tpu.memory_space<vmem>>, vector<256x64xbf16>
    %c0_2 = arith.constant 0 : index
    %c0_3 = arith.constant 0 : index
    %4 = vector.load %arg5[%c0_2, %c0_3] : memref<64x128xbf16, #tpu.memory_space<vmem>>, vector<64x128xbf16>
    %cst = arith.constant dense<0.000000e+00> : vector<256x128xf32>
    %5 = tpu.matmul %3, %4, %cst {dimension_numbers = #tpu.dot_dimension_numbers<[1], [0], [0], [1], [0, 0, 1, 1], [], []>} : vector<256x64xbf16>, vector<64x128xbf16>, vector<256x128xf32> -> vector<256x128xf32>
    %c0_4 = arith.constant 0 : index
    %c0_5 = arith.constant 0 : index
    %6 = vector.load %arg6[%c0_4, %c0_5] : memref<1x128xf32, #tpu.memory_space<vmem>>, vector<1x128xf32>
    %7 = vector.broadcast %6 : vector<1x128xf32> to vector<256x128xf32>
    %8 = arith.addf %5, %7 : vector<256x128xf32>
    %c0_6 = arith.constant 0 : index
    %c0_7 = arith.constant 0 : index
    %9 = vector.load %arg7[%c0_6, %c0_7] : memref<256x128xf32, #tpu.memory_space<vmem>>, vector<256x128xf32>
    tpu.vector_store %arg7[%c0_6, %c0_7], %8 {strides = array<i32>} : memref<256x128xf32, #tpu.memory_space<vmem>>, vector<256x128xf32>,
    return
  }
  func.func @transform_0(%arg0: i32, %arg1: i32) -> (i32, i32, i32, i32, i32) {
    %c0_i32 = arith.constant 0 : i32
    %c0_i32_0 = arith.constant 0 : i32
    %c0_i32_1 = arith.constant 0 : i32
    %c0_i32_2 = arith.constant 0 : i32
    %c0_i32_3 = arith.constant 0 : i32
    return %arg0, %c0_i32, %c0_i32_0, %c0_i32_1, %c0_i32_2 : i32, i32, i32, i32, i32
  }
  func.func @transform_1(%arg0: i32, %arg1: i32) -> (i32, i32) {
    %c0_i32 = arith.constant 0 : i32
    %c0_i32_0 = arith.constant 0 : i32
    %c0_i32_1 = arith.constant 0 : i32
    return %c0_i32, %c0_i32_0 : i32, i32
  }
  func.func @transform_2(%arg0: i32, %arg1: i32) -> (i32, i32) {
    %c0_i32 = arith.constant 0 : i32
    %c0_i32_0 = arith.constant 0 : i32
    %c0_i32_1 = arith.constant 0 : i32
    return %c0_i32, %c0_i32_0 : i32, i32
  }
  func.func @transform_3(%arg0: i32, %arg1: i32) -> (i32, i32) {
    %c0_i32 = arith.constant 0 : i32
    %c0_i32_0 = arith.constant 0 : i32
    return %c0_i32, %arg1 : i32, i32
  }
  func.func @transform_4(%arg0: i32, %arg1: i32) -> (i32, i32) {
    %c0_i32 = arith.constant 0 : i32
    %c0_i32_0 = arith.constant 0 : i32
    return %c0_i32, %arg1 : i32, i32
  }
  func.func @transform_5(%arg0: i32, %arg1: i32) -> (i32, i32) {
    %c0_i32 = arith.constant 0 : i32
    return %arg0, %arg1 : i32, i32
  }
}

</mosaic_0001>

<bundles_post_ra>
// kernel: _forward_nchw.1
= control target key start
LH: loop header
LB: loop body
LE: loop exit
PB: predicated region body
PF: predicated region fallthrough
CT: control target
= control target key end

     0   :  { %s3043_s18 = smov 0   ;;  %s3045_s19 = smov 0   ;;  %s4995_s0 = inlined_call_operand.vmem [shape: f32[8,8,9,9,64], index: 0, kind: input, shape index: {}]   ;;  %s4996_s1 = inlined_call_operand.vmem [shape: f32[16,64], index: 1, kind: input, shape index: {}]   ;;  %s4997_s2 = inlined_call_operand.vmem [shape: f32[1,64], index: 2, kind: input, shape index: {}]   ;;  %s4998_s3 = inlined_call_operand.vmem [shape: bf16[64,128], index: 3, kind: input, shape index: {}]   ;;  %s4999_s4 = inlined_call_operand.vmem [shape: f32[1,128], index: 4, kind: input, shape index: {}]   ;;  %s5000_s5 = inlined_call_operand.vmem [shape: f32[512,128], index: 5, kind: output, shape index: {}]  }
   0x1   :  { %s3047_s20 = smov 0  }
   0x2 LB: > { %s27_s21 = sadd.s32 1, %s3007_s19  ;;  %p2381_p0 = scmp.ge.s32.totalorder %s3011_s20, 1  ;;  %s3011_s20 = sphi %s3047_s20, %s15_s20   ;;  %s3007_s19 = sphi %s3045_s19, %s5005_s19   ;;  %s3003_s18 = sphi %s3043_s18, %s5004_s18  }
   0x3   : > { %p29_p1 = scmp.ge.s32.totalorder %s27_s21, 2  ;;  %p220_p2 = scmp.lt.s32.totalorder %s3011_s20, 3 }
   0x5   : > { %s5007_s21 = smov (%p29_p1, %s27_s21), 0  ;;  %p221_p3 = pnand %p2381_p0, %p220_p2 }
   0x7   : > { %224 = sbr.rel (%p221_p3) target bundleno = 525 (0x20d), region = 40 }
   0xe   : > { %v2983_v0 = vld [vmem:[%s4998_s3] sm:$0xff]   ;;  %s2382_s24 = sshll.u32 %s3003_s18, 2  ;;  %v322_v1 = vlaneseq  ;;  %v2984_v2 = vld [vmem:[%s4998_s3 + $0x8] sm:$0xff]   ;;  %v2985_v4 = vld [vmem:[%s4998_s3 + $0x10] sm:$0xff]   ;;  %vm1959_vm0 = vcmask 523264  }
   0xf   : > { %p260_p4 = scmp.lt.s32.totalorder %s2382_s24, 7  ;;  %2910 = vmatprep.subr.bf16.mxu0 %v2983_v0  ;;  %2950 = vmatprep.subr.bf16.mxu1 %v2983_v0  ;;  %v287_v5 = vld [vmem:[%s4996_s1] sm:$0xff]  ;;  %v2986_v14 = vld [vmem:[%s4998_s3 + $0x18] sm:$0xff]   ;;  %v3108_v18 = vld [vmem:[%s4996_s1 + $0x8] sm:$0xff] }
  0x10   : > { %v3070_v3 = vshrl.u32 %v322_v1, 7  ;;  %2911 = vmatpush3.bf16.msra.mxu0 %v2983_v0  ;;  %2954 = vmatpush3.bf16.msra.mxu1 %v2983_v0 }
  0x11   : > { %s5009_s24 = smov (!%p260_p4, %s2382_s24), 7  ;;  %2912 = vmatprep.subr.bf16.mxu0 %v2984_v2  ;;  %2951 = vmatprep.subr.bf16.mxu1 %v2984_v2 }
  0x12   : > { %v324_v6 = vsub.s32 0, %v3070_v3  ;;  %v425_v7 = vsub.s32 1, %v3070_v3  ;;  %s2958_s6 = smul.u32 1152, %s5009_s24  ;;  %v526_v8 = vsub.s32 2, %v3070_v3  ;;  %v627_v9 = vsub.s32 3, %v3070_v3  ;;  %s2384_s24 = sshll.u32 %s3003_s18, 5 }
  0x13   : > { %v728_v10 = vsub.s32 4, %v3070_v3  ;;  %v829_v13 = vsub.s32 5, %v3070_v3  ;;  %v930_v17 = vsub.s32 6, %v3070_v3  ;;  %v1031_v22 = vsub.s32 7, %v3070_v3  ;;  %p274_p5 = scmp.lt.s32.totalorder %s2384_s24, 63 }
  0x14   : > { %v3083_v11 = vrot.slane %v287_v5, %v324_v6  ;;  %v3085_v12 = vrot.slane %v287_v5, %v425_v7  ;;  %2913 = vmatpush3.bf16.msra.mxu0 %v2984_v2  ;;  %2955 = vmatpush3.bf16.msra.mxu1 %v2984_v2  ;;  %s3094_s11 = scalar_lea.vmem %s4995_s0, %s2958_s6  ;;  %v3098_v15 = vrot.slane %v287_v5, %v526_v8 }
  0x15   : > { %v3102_v16 = vrot.slane %v287_v5, %v627_v9  ;;  %2914 = vmatprep.subr.bf16.mxu0 %v2985_v4  ;;  %2952 = vmatprep.subr.bf16.mxu1 %v2985_v4  ;;  %v290_v19 = vld [vmem:[%s3094_s11] sm:$0xff]  ;;  %v291_v20 = vld [vmem:[%s3094_s11 + $0x10] sm:$0xff]  ;;  %v3122_v29 = vrot.slane %v287_v5, %v728_v10  ;;  %v3132_v36 = vrot.slane %v287_v5, %v829_v13  ;;  %s5011_s24 = smov (!%p274_p5, %s2384_s24), 63 }
  0x16   : > { %v2386_v21 = vld [vmem:[%s3094_s11 + $0x90] sm:$0xff]  ;;  %v326_v23 = vmul.f32 %v3083_v11, %v290_v19  ;;  %v327_v24 = vmul.f32 %v3083_v11, %v291_v20  ;;  %v2387_v25 = vld [vmem:[%s3094_s11 + $0xa0] sm:$0xff]  ;;  %v3140_v42 = vrot.slane %v287_v5, %v930_v17  ;;  %v3149_v47 = vrot.slane %v287_v5, %v1031_v22  ;;  %s2385_s25 = sshll.u32 %s5011_s24, 3 }
  0x17   : > { %v427_v26 = vmul.f32 %v2386_v21, %v3085_v12  ;;  %v2418_v27 = vld [vmem:[%s3094_s11 + $0x240] sm:$0xff]  ;;  %v2419_v28 = vld [vmem:[%s3094_s11 + $0x250] sm:$0xff]  ;;  %v428_v30 = vmul.f32 %v2387_v25, %v3085_v12  ;;  %v3157_v52 = vrot.slane %v3108_v18, %v324_v6  ;;  %v3160_v53 = vrot.slane %v3108_v18, %v425_v7  ;;  %s4919_s18 = scalar_lea.vmem %s5000_s5, %s2385_s25 }
  0x18   : > { %v528_v31 = vmul.f32 %v2418_v27, %v3098_v15  ;;  %v529_v32 = vmul.f32 %v2419_v28, %v3098_v15  ;;  %v2450_v33 = vld [vmem:[%s3094_s11 + $0x2d0] sm:$0xff]  ;;  %v2451_v34 = vld [vmem:[%s3094_s11 + $0x2e0] sm:$0xff]  ;;  %2915 = vmatpush3.bf16.msra.mxu0 %v2985_v4  ;;  %2956 = vmatpush3.bf16.msra.mxu1 %v2985_v4  ;;  %v3174_v0 = vrot.slane %v3108_v18, %v526_v8 }
  0x19   : > { %v2482_v35 = vld [vmem:[%s3094_s11 + $0x120] sm:$0xff]  ;;  %v459_v37 = vadd.f32 %v427_v26, %v326_v23  ;;  %v629_v38 = vmul.f32 %v2450_v33, %v3102_v16  ;;  %v2483_v39 = vld [vmem:[%s3094_s11 + $0x130] sm:$0xff]  ;;  %2916 = vmatprep.subr.bf16.mxu0 %v2986_v14  ;;  %2953 = vmatprep.subr.bf16.mxu1 %v2986_v14  ;;  %v460_v43 = vadd.f32 %v428_v30, %v327_v24 }
  0x1a   : > { %v2514_v40 = vld [vmem:[%s3094_s11 + $0x1b0] sm:$0xff]  ;;  %v2515_v41 = vld [vmem:[%s3094_s11 + $0x1c0] sm:$0xff]  ;;  %v630_v44 = vmul.f32 %v2451_v34, %v3102_v16  ;;  %v730_v49 = vmul.f32 %v2482_v35, %v3122_v29  ;;  %v731_v55 = vmul.f32 %v2483_v39, %v3122_v29  ;;  %v3182_v4 = vrot.slane %v3108_v18, %v627_v9 }
  0x1b   : > { %v2546_v45 = vld [vmem:[%s3094_s11 + $0x360] sm:$0xff]  ;;  %v3145_v46 = vld [vmem:[%s3094_s11 + $0x370] sm:$0xff]  ;;  %v560_v48 = vadd.f32 %v528_v31, %v459_v37  ;;  %v561_v54 = vadd.f32 %v529_v32, %v460_v43  ;;  %v831_v56 = vmul.f32 %v2514_v40, %v3132_v36  ;;  %v832_v57 = vmul.f32 %v2515_v41, %v3132_v36 }
  0x1c   : > { %v2578_v50 = vld [vmem:[%s3094_s11 + $0x3f0] sm:$0xff]  ;;  %v3154_v51 = vld [vmem:[%s3094_s11 + $0x400] sm:$0xff]  ;;  %2917 = vmatpush3.bf16.msra.mxu0 %v2986_v14  ;;  %2957 = vmatpush3.bf16.msra.mxu1 %v2986_v14  ;;  %v932_v59 = vmul.f32 %v2546_v45, %v3140_v42  ;;  %v933_v60 = vmul.f32 %v3145_v46, %v3140_v42  ;;  %v3187_v5 = vrot.slane %v3108_v18, %v728_v10 }
  0x1d   : > { %v661_v58 = vadd.f32 %v629_v38, %v560_v48  ;;  %v662_v61 = vadd.f32 %v630_v44, %v561_v54  ;;  %v1033_v62 = vmul.f32 %v2578_v50, %v3149_v47  ;;  %v1034_v63 = vmul.f32 %v3154_v51, %v3149_v47  ;;  %v3177_v2 = vld [vmem:[%s3094_s11 + $0x20] sm:$0xff]  ;;  %v3198_v9 = vld [vmem:[%s3094_s11 + $0xb0] sm:$0xff] }
  0x1e   : > { %v3192_v6 = vrot.slane %v3108_v18, %v829_v13  ;;  %v1134_v8 = vmul.f32 %v3157_v52, %v291_v20  ;;  %v1135_v14 = vmul.f32 %v3177_v2, %v3157_v52  ;;  %v1235_v19 = vmul.f32 %v2387_v25, %v3160_v53  ;;  %v3202_v21 = vld [vmem:[%s3094_s11 + $0x260] sm:$0xff]  ;;  %v3205_v10 = vld [vmem:[%s3094_s11 + $0x2f0] sm:$0xff] }
  0x1f   : > { %v762_v1 = vadd.f32 %v730_v49, %v661_v58  ;;  %v763_v7 = vadd.f32 %v731_v55, %v662_v61  ;;  %v1236_v13 = vmul.f32 %v3198_v9, %v3160_v53  ;;  %v1336_v20 = vmul.f32 %v2419_v28, %v3174_v0  ;;  %v306_v26 = vld [vmem:[%s3094_s11 + $0x900] sm:$0xff]  ;;  %v3214_v27 = vld [vmem:[%s3094_s11 + $0x910] sm:$0xff] }
  0x20   : > { %v1337_v24 = vmul.f32 %v3202_v21, %v3174_v0  ;;  %v2402_v25 = vld [vmem:[%s3094_s11 + $0x990] sm:$0xff]  ;;  %v1437_v31 = vmul.f32 %v2451_v34, %v3182_v4  ;;  %v3220_v32 = vmul.f32 %v3205_v10, %v3182_v4  ;;  %v3223_v33 = vld [vmem:[%s3094_s11 + $0x140] sm:$0xff]  ;;  %v3228_v28 = vrot.slane %v3108_v18, %v930_v17 }
  0x21   : > { %v863_v23 = vadd.f32 %v831_v56, %v762_v1  ;;  %v864_v30 = vadd.f32 %v832_v57, %v763_v7  ;;  %v3231_v35 = vld [vmem:[%s3094_s11 + $0x9a0] sm:$0xff]  ;;  %v3234_v38 = vmul.f32 %v2483_v39, %v3187_v5  ;;  %v3238_v34 = vmul.f32 %v3223_v33, %v3187_v5  ;;  %v3245_v44 = vld [vmem:[%s3094_s11 + $0xb50] sm:$0xff] }
  0x22   : > { %v3241_v40 = vmul.f32 %v2515_v41, %v3192_v6  ;;  %v2434_v43 = vld [vmem:[%s3094_s11 + $0xb40] sm:$0xff]  ;;  %v3248_v17 = vld [vmem:[%s3094_s11 + $0x1d0] sm:$0xff]  ;;  %v342_v48 = vmul.f32 %v3083_v11, %v306_v26  ;;  %v343_v39 = vmul.f32 %v3083_v11, %v3214_v27  ;;  %v443_v49 = vmul.f32 %v2402_v25, %v3085_v12 }
  0x23   : > { %v964_v37 = vadd.f32 %v932_v59, %v863_v23  ;;  %v965_v45 = vadd.f32 %v933_v60, %v864_v30  ;;  %v2466_v50 = vld [vmem:[%s3094_s11 + $0xbd0] sm:$0xff]  ;;  %v3256_v54 = vld [vmem:[%s3094_s11 + $0xbe0] sm:$0xff]  ;;  %v3260_v55 = vmul.f32 %v3248_v17, %v3192_v6  ;;  %v3265_v56 = vrot.slane %v3108_v18, %v1031_v22 }
  0x24   : > { %v444_v57 = vmul.f32 %v3231_v35, %v3085_v12  ;;  %v2498_v58 = vld [vmem:[%s3094_s11 + $0xa20] sm:$0xff]  ;;  %v475_v60 = vadd.f32 %v443_v49, %v342_v48  ;;  %v544_v61 = vmul.f32 %v2434_v43, %v3098_v15  ;;  %v2499_v1 = vld [vmem:[%s3094_s11 + $0xa30] sm:$0xff]  ;;  %v645_v18 = vmul.f32 %v2466_v50, %v3102_v16 }
  0x25   : > { %v1065_v41 = vadd.f32 %v1033_v62, %v964_v37  ;;  %v1066_v59 = vadd.f32 %v1034_v63, %v965_v45  ;;  %v545_v62 = vmul.f32 %v3245_v44, %v3098_v15  ;;  %v646_v22 = vmul.f32 %v3256_v54, %v3102_v16  ;;  %v2530_v23 = vld [vmem:[%s3094_s11 + $0xab0] sm:$0xff]  ;;  %v3279_v63 = vld [vmem:[%s3094_s11 + $0x380] sm:$0xff] }
  0x26   : > { %v476_v3 = vadd.f32 %v444_v57, %v343_v39  ;;  %v1740_v25 = vmul.f32 %v3145_v46, %v3228_v28  ;;  %v576_v30 = vadd.f32 %v544_v61, %v475_v60  ;;  %v2531_v37 = vld [vmem:[%s3094_s11 + $0xac0] sm:$0xff]  ;;  %v1741_v45 = vmul.f32 %v3279_v63, %v3228_v28 }
  0x27   : > { %v1166_v7 = vadd.f32 %v1134_v8, %v1065_v41  ;;  %v1167_v26 = vadd.f32 %v1135_v14, %v1066_v59  ;;  %v746_v8 = vmul.f32 %v2498_v58, %v3122_v29  ;;  %v747_v39 = vmul.f32 %v2499_v1, %v3122_v29  ;;  %v2562_v49 = vld [vmem:[%s3094_s11 + $0xc60] sm:$0xff]  ;;  %v3290_v14 = vld [vmem:[%s3094_s11 + $0xc70] sm:$0xff] }
  0x28   : > { %v577_v48 = vadd.f32 %v545_v62, %v476_v3  ;;  %v3293_v41 = vld [vmem:[%s3094_s11 + $0x410] sm:$0xff]  ;;  %v1841_v46 = vmul.f32 %v3154_v51, %v3265_v56  ;;  %v677_v57 = vadd.f32 %v645_v18, %v576_v30  ;;  %v847_v58 = vmul.f32 %v2530_v23, %v3132_v36  ;;  %v3300_v59 = vld [vmem:[%s3094_s11 + $0xd00] sm:$0xff] }
  0x29   : > { %v1267_v43 = vadd.f32 %v1235_v19, %v1166_v7  ;;  %v1268_v50 = vadd.f32 %v1236_v13, %v1167_v26  ;;  %v2594_v19 = vld [vmem:[%s3094_s11 + $0xcf0] sm:$0xff]  ;;  %v1842_v61 = vmul.f32 %v3293_v41, %v3265_v56  ;;  %v848_v13 = vmul.f32 %v2531_v37, %v3132_v36 }
  0x2a   : > { %v678_v62 = vadd.f32 %v646_v22, %v577_v48  ;;  %v778_v3 = vadd.f32 %v746_v8, %v677_v57  ;;  %v948_v26 = vmul.f32 %v2562_v49, %v3140_v42  ;;  %v949_v51 = vmul.f32 %v3290_v14, %v3140_v42  ;;  %v3320_v49 = vld [vmem:[%s3094_s11 + $0x9b0] sm:$0xff]  ;;  %v3328_v57 = vld [vmem:[%s3094_s11 + $0xb60] sm:$0xff] }
  0x2b   : > { %v1368_v60 = vadd.f32 %v1336_v20, %v1267_v43  ;;  %v1369_v7 = vadd.f32 %v1337_v24, %v1268_v50  ;;  %v1049_v30 = vmul.f32 %v2594_v19, %v3149_v47  ;;  %v1050_v20 = vmul.f32 %v3300_v59, %v3149_v47  ;;  %v3312_v43 = vld [vmem:[%s3094_s11 + $0x920] sm:$0xff] }
  0x2c   : > { %v779_v23 = vadd.f32 %v747_v39, %v678_v62  ;;  %v879_v24 = vadd.f32 %v847_v58, %v778_v3  ;;  %v1150_v8 = vmul.f32 %v3157_v52, %v3214_v27  ;;  %v1151_v48 = vmul.f32 %v3312_v43, %v3157_v52  ;;  %v3347_v3 = vld [vmem:[%s3094_s11 + $0x30] sm:$0xff] }
  0x2d   : > { %v1469_v18 = vadd.f32 %v1437_v31, %v1368_v60  ;;  %v1470_v22 = vadd.f32 %v3220_v32, %v1369_v7  ;;  %v1251_v50 = vmul.f32 %v3231_v35, %v3160_v53  ;;  %v1252_v32 = vmul.f32 %v3320_v49, %v3160_v53  ;;  %v3336_v60 = vld [vmem:[%s3094_s11 + $0xbf0] sm:$0xff]  ;;  %v3344_v7 = vld [vmem:[%s3094_s11 + $0xa40] sm:$0xff] }
  0x2e   : > { %v880_v39 = vadd.f32 %v848_v13, %v779_v23  ;;  %v980_v58 = vadd.f32 %v948_v26, %v879_v24  ;;  %v1352_v19 = vmul.f32 %v3245_v44, %v3174_v0  ;;  %v1453_v13 = vmul.f32 %v3256_v54, %v3182_v4  ;;  %v3354_v23 = vld [vmem:[%s3094_s11 + $0xad0] sm:$0xff] }
  0x2f   : > { %v1570_v31 = vadd.f32 %v3234_v38, %v1469_v18  ;;  %v1571_v27 = vadd.f32 %v3238_v34, %v1470_v22  ;;  %v1353_v38 = vmul.f32 %v3328_v57, %v3174_v0  ;;  %v1454_v34 = vmul.f32 %v3336_v60, %v3182_v4  ;;  %5002 = vst [vmem:[#allocation3_spill] sm:$0xff] %v3354_v23 }
  0x30   : > { %v981_v62 = vadd.f32 %v949_v51, %v880_v39  ;;  %v1081_v26 = vadd.f32 %v1049_v30, %v980_v58  ;;  %v1554_v18 = vmul.f32 %v2499_v1, %v3187_v5  ;;  %v3357_v51 = vld [vmem:[%s3094_s11 + $0xc0] sm:$0xff]  ;;  %v1655_v24 = vmul.f32 %v2531_v37, %v3192_v6  ;;  %v3363_v39 = vld [vmem:[%s3094_s11 + $0x270] sm:$0xff] }
  0x31   : > { %v1671_v35 = vadd.f32 %v3241_v40, %v1570_v31  ;;  %v1672_v44 = vadd.f32 %v3260_v55, %v1571_v27  ;;  %v1555_v40 = vmul.f32 %v3344_v7, %v3187_v5  ;;  %v1656_v31 = vmul.f32 %v3354_v23, %v3192_v6  ;;  %v3368_v55 = vld [vmem:[%s4997_s2] ss:$0 sm:$0xff] }
  0x32   : > { %v1082_v22 = vadd.f32 %v1050_v20, %v981_v62  ;;  %v1182_v30 = vadd.f32 %v1150_v8, %v1081_v26  ;;  %v328_v27 = vmul.f32 %v3177_v2, %v3083_v11  ;;  %v429_v58 = vmul.f32 %v3198_v9, %v3085_v12  ;;  %v3379_v62 = vld [vmem:[%s3094_s11 + $0x300] sm:$0xff] }
  0x33   : > { %v1772_v54 = vadd.f32 %v1740_v25, %v1671_v35  ;;  %v1773_v1 = vadd.f32 %v1741_v45, %v1672_v44  ;;  %v329_v25 = vmul.f32 %v3083_v11, %v3347_v3  ;;  %v430_v35 = vmul.f32 %v3357_v51, %v3085_v12 }
  0x34   : > { %v1183_v20 = vadd.f32 %v1151_v48, %v1082_v22  ;;  %v1283_v8 = vadd.f32 %v1251_v50, %v1182_v30  ;;  %v530_v44 = vmul.f32 %v3202_v21, %v3098_v15  ;;  %v531_v2 = vmul.f32 %v3363_v39, %v3098_v15  ;;  %v3395_v50 = vld [vmem:[%s3094_s11 + $0x1e0] sm:$0xff] }
  0x35   : > { %v1873_v37 = vadd.f32 %v1841_v46, %v1772_v54  ;;  %v1874_v45 = vadd.f32 %v1842_v61, %v1773_v1  ;;  %v461_v26 = vadd.f32 %v429_v58, %v328_v27  ;;  %v462_v9 = vadd.f32 %v430_v35, %v329_v25  ;;  %v3387_v54 = vld [vmem:[%s3094_s11 + $0x150] sm:$0xff]  ;;  %v3407_v35 = vld [vmem:[%s3094_s11 + $0xc80] sm:$0xff] }
  0x36   : > { %v1284_v48 = vadd.f32 %v1252_v32, %v1183_v20  ;;  %v1384_v23 = vadd.f32 %v1352_v19, %v1283_v8  ;;  %v631_v61 = vmul.f32 %v3205_v10, %v3102_v16  ;;  %v632_v21 = vmul.f32 %v3379_v62, %v3102_v16  ;;  %v3404_v20 = vld [vmem:[%s3094_s11 + $0x390] sm:$0xff] }
  0x37   : > { %v1911_v46 = vadd.f32 %v3368_v55, %v1873_v37  ;;  %v1912_v22 = vadd.f32 %v3368_v55, %v1874_v45  ;;  %v562_v30 = vadd.f32 %v530_v44, %v461_v26  ;;  %v563_v32 = vadd.f32 %v531_v2, %v462_v9  ;;  %v3422_v2 = vld [vmem:[%s3094_s11 + $0xd10] sm:$0xff] }
  0x38   : > { %v1385_v1 = vadd.f32 %v1353_v38, %v1284_v48  ;;  %v732_v27 = vmul.f32 %v3223_v33, %v3122_v29  ;;  %v1485_v37 = vadd.f32 %v1453_v13, %v1384_v23  ;;  %v733_v19 = vmul.f32 %v3387_v54, %v3122_v29 }
  0x39   : > { %v1943_v25 = vpack.c.bf16 %v1912_v22, %v1911_v46  ;;  %v833_v10 = vmul.f32 %v3248_v17, %v3132_v36  ;;  %v663_v38 = vadd.f32 %v631_v61, %v562_v30  ;;  %v664_v45 = vadd.f32 %v632_v21, %v563_v32  ;;  %v3435_v30 = vld [vmem:[%s3094_s11 + $0x40] sm:$0xff] }
  0x3a   : > { %v1486_v58 = vadd.f32 %v1454_v34, %v1385_v1  ;;  %v834_v33 = vmul.f32 %v3395_v50, %v3132_v36  ;;  %v1586_v13 = vadd.f32 %v1554_v18, %v1485_v37  ;;  %v1756_v23 = vmul.f32 %v3290_v14, %v3228_v28  ;;  %v3419_v34 = vld [vmem:[%s3094_s11 + $0x420] sm:$0xff] }
  0x3b   : > { %1960 = vst.msk [vmem:[#allocation2] sm:$0xff] %vm1959_vm0, %v1943_v25  ;;  %v1757_v8 = vmul.f32 %v3407_v35, %v3228_v28  ;;  %v934_v17 = vmul.f32 %v3279_v63, %v3140_v42  ;;  %v764_v46 = vadd.f32 %v732_v27, %v663_v38  ;;  %v765_v48 = vadd.f32 %v733_v19, %v664_v45 }
  0x3c   : > { %v1587_v44 = vadd.f32 %v1555_v40, %v1486_v58  ;;  %v935_v18 = vmul.f32 %v3404_v20, %v3140_v42  ;;  %v1687_v26 = vadd.f32 %v1655_v24, %v1586_v13  ;;  %v1857_v14 = vmul.f32 %v3300_v59, %v3265_v56 }
  0x3d   : > { %v1858_v9 = vmul.f32 %v3422_v2, %v3265_v56  ;;  %v1035_v63 = vmul.f32 %v3293_v41, %v3149_v47  ;;  %v865_v22 = vadd.f32 %v833_v10, %v764_v46  ;;  %v866_v61 = vadd.f32 %v834_v33, %v765_v48  ;;  %v3449_v10 = vld [vmem:[%s3094_s11 + $0x280] sm:$0xff] }
  0x3e   : > { %v1688_v40 = vadd.f32 %v1656_v31, %v1587_v44  ;;  %v1036_v21 = vmul.f32 %v3419_v34, %v3149_v47  ;;  %v1788_v1 = vadd.f32 %v1756_v23, %v1687_v26  ;;  %v1136_v59 = vmul.f32 %v3157_v52, %v3347_v3  ;;  %v3442_v31 = vld [vmem:[%s3094_s11 + $0xd0] sm:$0xff] }
  0x3f   : > { %v966_v32 = vadd.f32 %v934_v17, %v865_v22  ;;  %v967_v27 = vadd.f32 %v935_v18, %v866_v61  ;;  %v1137_v41 = vmul.f32 %v3435_v30, %v3157_v52  ;;  %v1237_v37 = vmul.f32 %v3357_v51, %v3160_v53  ;;  %v3452_v3 = vld [vmem:[%s3094_s11 + $0x310] sm:$0xff]  ;;  %v3485_v22 = vld [vmem:[%s3094_s11 + $0xc00] sm:$0xff] }
  0x40   : > { %v1789_v24 = vadd.f32 %v1757_v8, %v1688_v40  ;;  %v1889_v25 = vadd.f32 %v1857_v14, %v1788_v1  ;;  %v1238_v19 = vmul.f32 %v3442_v31, %v3160_v53  ;;  %v1338_v13 = vmul.f32 %v3363_v39, %v3174_v0  ;;  %v3457_v23 = vld [vmem:[%s3094_s11 + $0x930] sm:$0xff]  ;;  %v3460_v8 = vld [vmem:[%s3094_s11 + $0x9c0] sm:$0xff] }
  0x41   : > { %v1067_v45 = vadd.f32 %v1035_v63, %v966_v32  ;;  %v1068_v33 = vadd.f32 %v1036_v21, %v967_v27  ;;  %v1339_v17 = vmul.f32 %v3449_v10, %v3174_v0  ;;  %v1439_v44 = vmul.f32 %v3379_v62, %v3182_v4  ;;  %v3474_v14 = vld [vmem:[%s3094_s11 + $0xb70] sm:$0xff] }
  0x42   : > { %v1976_v58 = vld [vmem:[#allocation2] sm:$0xff]  ;;  %v1890_v38 = vadd.f32 %v1858_v9, %v1789_v24  ;;  %v1927_v51 = vadd.f32 %v3368_v55, %v1889_v25  ;;  %v1440_v46 = vmul.f32 %v3452_v3, %v3182_v4  ;;  %v1540_v26 = vmul.f32 %v3387_v54, %v3187_v5 }
  0x43   : > { %2918 = vmatprep.mubr.msk.bf16.mxu0 %vm1959_vm0, %v1976_v58  ;;  %v1168_v48 = vadd.f32 %v1136_v59, %v1067_v45  ;;  %v1169_v18 = vadd.f32 %v1137_v41, %v1068_v33  ;;  %v344_v9 = vmul.f32 %v3312_v43, %v3083_v11  ;;  %v345_v62 = vmul.f32 %v3083_v11, %v3457_v23  ;;  %v3490_v43 = vld [vmem:[%s3094_s11 + $0xa50] sm:$0xff]  ;;  %v3493_v59 = vld [vmem:[%s3094_s11 + $0x160] sm:$0xff] }
  0x44   : > { %v1928_v39 = vadd.f32 %v3368_v55, %v1890_v38  ;;  %v445_v63 = vmul.f32 %v3320_v49, %v3085_v12  ;;  %v446_v40 = vmul.f32 %v3460_v8, %v3085_v12  ;;  %v546_v1 = vmul.f32 %v3328_v57, %v3098_v15  ;;  %v3508_v58 = vld [vmem:[%s3094_s11 + $0x1f0] sm:$0xff] }
  0x45   : > { %v1269_v54 = vadd.f32 %v1237_v37, %v1168_v48  ;;  %v1270_v21 = vadd.f32 %v1238_v19, %v1169_v18  ;;  %v547_v49 = vmul.f32 %v3474_v14, %v3098_v15  ;;  %v647_v27 = vmul.f32 %v3336_v60, %v3102_v16  ;;  %v3505_v19 = vld [vmem:[%s3094_s11 + $0xae0] sm:$0xff]  ;;  %v3519_v48 = vld [vmem:[%s3094_s11 + $0xc90] sm:$0xff] }
  0x46   : > { %v1951_v61 = vpack.c.bf16 %v1928_v39, %v1927_v51  ;;  %v477_v24 = vadd.f32 %v445_v63, %v344_v9  ;;  %v478_v32 = vadd.f32 %v446_v40, %v345_v62  ;;  %v1541_v57 = vmul.f32 %v3493_v59, %v3187_v5  ;;  %v3522_v18 = vld [vmem:[%s3094_s11 + $0x3a0] sm:$0xff] }
  0x47   : > { %v1370_v41 = vadd.f32 %v1338_v13, %v1269_v54  ;;  %v1371_v25 = vadd.f32 %v1339_v17, %v1270_v21  ;;  %v648_v37 = vmul.f32 %v3485_v22, %v3102_v16  ;;  %v748_v60 = vmul.f32 %v3344_v7, %v3122_v29  ;;  %v5003_v7 = vld [vmem:[#allocation3_spill] sm:$0xff]  ;;  %v3536_v21 = vld [vmem:[%s3094_s11 + $0x430] sm:$0xff] }
  0x48   : > { %1968 = vst.msk [vmem:[#allocation2 + $0x40] sm:$0xff] %vm1959_vm0, %v1951_v61  ;;  %v578_v38 = vadd.f32 %v546_v1, %v477_v24  ;;  %v579_v45 = vadd.f32 %v547_v49, %v478_v32  ;;  %v749_v33 = vmul.f32 %v3490_v43, %v3122_v29  ;;  %v1641_v17 = vmul.f32 %v3395_v50, %v3192_v6  ;;  %v3533_v54 = vld [vmem:[%s3094_s11 + $0xd20] sm:$0xff] }
  0x49   : > { %v1471_v13 = vadd.f32 %v1439_v44, %v1370_v41  ;;  %v1472_v51 = vadd.f32 %v1440_v46, %v1371_v25  ;;  %v1642_v39 = vmul.f32 %v3508_v58, %v3192_v6  ;;  %v849_v63 = vmul.f32 %v5003_v7, %v3132_v36 }
  0x4a   : > { %v679_v9 = vadd.f32 %v647_v27, %v578_v38  ;;  %v680_v62 = vadd.f32 %v648_v37, %v579_v45  ;;  %v850_v40 = vmul.f32 %v3505_v19, %v3132_v36  ;;  %v1742_v50 = vmul.f32 %v3404_v20, %v3228_v28  ;;  %v3551_v45 = vld [vmem:[%s3094_s11 + $0x940] sm:$0xff] }
  0x4b   : > { %v1572_v44 = vadd.f32 %v1540_v26, %v1471_v13  ;;  %v1573_v46 = vadd.f32 %v1541_v57, %v1472_v51  ;;  %v1743_v61 = vmul.f32 %v3522_v18, %v3228_v28  ;;  %v950_v32 = vmul.f32 %v3407_v35, %v3140_v42  ;;  %v3559_v51 = vld [vmem:[%s3094_s11 + $0x9d0] sm:$0xff] }
  0x4c   : > { %v780_v1 = vadd.f32 %v748_v60, %v679_v9  ;;  %v781_v24 = vadd.f32 %v749_v33, %v680_v62  ;;  %v951_v26 = vmul.f32 %v3519_v48, %v3140_v42  ;;  %v1843_v20 = vmul.f32 %v3419_v34, %v3265_v56  ;;  %v3566_v62 = vld [vmem:[%s3094_s11 + $0xb80] sm:$0xff] }
  0x4d   : > { %v1673_v49 = vadd.f32 %v1641_v17, %v1572_v44  ;;  %v1674_v27 = vadd.f32 %v1642_v39, %v1573_v46  ;;  %v1844_v41 = vmul.f32 %v3536_v21, %v3265_v56  ;;  %v1051_v38 = vmul.f32 %v3422_v2, %v3149_v47  ;;  %v3573_v44 = vld [vmem:[%s3094_s11 + $0xc10] sm:$0xff] }
  0x4e   : > { %v881_v57 = vadd.f32 %v849_v63, %v780_v1  ;;  %v882_v37 = vadd.f32 %v850_v40, %v781_v24  ;;  %v1052_v35 = vmul.f32 %v3533_v54, %v3149_v47  ;;  %v1152_v33 = vmul.f32 %v3157_v52, %v3457_v23  ;;  %v3576_v46 = vld [vmem:[%s3094_s11 + $0x50] sm:$0xff]  ;;  %v3583_v24 = vld [vmem:[%s3094_s11 + $0xe0] sm:$0xff] }
  0x4f   : > { %v1984_v25 = vld [vmem:[#allocation2 + $0x40] sm:$0xff]  ;;  %v1774_v34 = vadd.f32 %v1742_v50, %v1673_v49  ;;  %v1775_v60 = vadd.f32 %v1743_v61, %v1674_v27  ;;  %v1153_v13 = vmul.f32 %v3551_v45, %v3157_v52  ;;  %v1253_v39 = vmul.f32 %v3460_v8, %v3160_v53 }
  0x50   : > { %2934 = vmatprep.mubr.msk.bf16.mxu1 %vm1959_vm0, %v1984_v25  ;;  %v982_v2 = vadd.f32 %v950_v32, %v881_v57  ;;  %v983_v17 = vadd.f32 %v951_v26, %v882_v37  ;;  %v1254_v9 = vmul.f32 %v3559_v51, %v3160_v53  ;;  %v1354_v23 = vmul.f32 %v3474_v14, %v3174_v0  ;;  %v3586_v32 = vld [vmem:[%s3094_s11 + $0x290] sm:$0xff]  ;;  %v3599_v57 = vld [vmem:[%s3094_s11 + $0x320] sm:$0xff] }
  0x51   : > { %v1875_v7 = vadd.f32 %v1843_v20, %v1774_v34  ;;  %v1876_v63 = vadd.f32 %v1844_v41, %v1775_v60  ;;  %v1355_v40 = vmul.f32 %v3566_v62, %v3174_v0  ;;  %v1455_v61 = vmul.f32 %v3485_v22, %v3182_v4  ;;  %v3608_v60 = vld [vmem:[%s3094_s11 + $0xa60] sm:$0xff] }
  0x52   : > { %v1083_v50 = vadd.f32 %v1051_v38, %v982_v2  ;;  %v1084_v8 = vadd.f32 %v1052_v35, %v983_v17  ;;  %v1456_v1 = vmul.f32 %v3573_v44, %v3182_v4  ;;  %v1556_v49 = vmul.f32 %v3490_v43, %v3187_v5 }
  0x53   : > { %v1913_v14 = vadd.f32 %v3368_v55, %v1875_v7  ;;  %v1914_v26 = vadd.f32 %v3368_v55, %v1876_v63  ;;  %v330_v27 = vmul.f32 %v3435_v30, %v3083_v11  ;;  %v331_v41 = vmul.f32 %v3083_v11, %v3576_v46  ;;  %v3623_v63 = vld [vmem:[%s3094_s11 + $0xaf0] sm:$0xff] }
  0x54   : > { %v1184_v22 = vadd.f32 %v1152_v33, %v1083_v50  ;;  %v1185_v20 = vadd.f32 %v1153_v13, %v1084_v8  ;;  %v431_v25 = vmul.f32 %v3442_v31, %v3085_v12  ;;  %v432_v38 = vmul.f32 %v3583_v24, %v3085_v12  ;;  %v3613_v13 = vld [vmem:[%s3094_s11 + $0x170] sm:$0xff]  ;;  %v3628_v8 = vld [vmem:[%s3094_s11 + $0x200] sm:$0xff] }
  0x55   : > { %v1944_v37 = vpack.c.bf16 %v1914_v26, %v1913_v14  ;;  %v532_v43 = vmul.f32 %v3449_v10, %v3098_v15  ;;  %v533_v30 = vmul.f32 %v3586_v32, %v3098_v15  ;;  %v633_v31 = vmul.f32 %v3452_v3, %v3102_v16 }
  0x56   : > { %v1285_v35 = vadd.f32 %v1253_v39, %v1184_v22  ;;  %v1286_v34 = vadd.f32 %v1254_v9, %v1185_v20  ;;  %v463_v33 = vadd.f32 %v431_v25, %v330_v27  ;;  %v1557_v2 = vmul.f32 %v3608_v60, %v3187_v5  ;;  %v3637_v22 = vld [vmem:[%s3094_s11 + $0xca0] sm:$0xff] }
  0x57   : > { %1961 = vst.msk [vmem:[#allocation2 + $0x8] sm:$0xff] %vm1959_vm0, %v1944_v37  ;;  %v1657_v10 = vmul.f32 %v3505_v19, %v3192_v6  ;;  %v464_v17 = vadd.f32 %v432_v38, %v331_v41  ;;  %v634_v39 = vmul.f32 %v3599_v57, %v3102_v16  ;;  %v734_v50 = vmul.f32 %v3493_v59, %v3122_v29  ;;  %v3642_v41 = vld [vmem:[%s3094_s11 + $0x3b0] sm:$0xff] }
  0x58   : > { %v1386_v9 = vadd.f32 %v1354_v23, %v1285_v35  ;;  %v1387_v7 = vadd.f32 %v1355_v40, %v1286_v34  ;;  %v564_v3 = vadd.f32 %v532_v43, %v463_v33  ;;  %v1658_v14 = vmul.f32 %v3623_v63, %v3192_v6 }
  0x59   : > { %v1758_v19 = vmul.f32 %v3519_v48, %v3228_v28  ;;  %v565_v26 = vadd.f32 %v533_v30, %v464_v17  ;;  %v735_v23 = vmul.f32 %v3613_v13, %v3122_v29  ;;  %v835_v59 = vmul.f32 %v3508_v58, %v3132_v36  ;;  %v3654_v30 = vld [vmem:[%s3094_s11 + $0xd30] sm:$0xff] }
  0x5a   : > { %v1487_v40 = vadd.f32 %v1455_v61, %v1386_v9  ;;  %v1488_v27 = vadd.f32 %v1456_v1, %v1387_v7  ;;  %v665_v20 = vadd.f32 %v633_v31, %v564_v3  ;;  %v1759_v25 = vmul.f32 %v3637_v22, %v3228_v28  ;;  %v3651_v61 = vld [vmem:[%s3094_s11 + $0x440] sm:$0xff] }
  0x5b   : > { %v1859_v48 = vmul.f32 %v3533_v54, %v3265_v56  ;;  %v666_v37 = vadd.f32 %v634_v39, %v565_v26  ;;  %v836_v38 = vmul.f32 %v3628_v8, %v3132_v36  ;;  %v936_v35 = vmul.f32 %v3522_v18, %v3140_v42  ;;  %v3667_v18 = vld [vmem:[%s3094_s11 + $0x60] sm:$0xff] }
  0x5c   : > { %v1588_v1 = vadd.f32 %v1556_v49, %v1487_v40  ;;  %v1589_v43 = vadd.f32 %v1557_v2, %v1488_v27  ;;  %v766_v58 = vadd.f32 %v734_v50, %v665_v20  ;;  %v1860_v34 = vmul.f32 %v3654_v30, %v3265_v56  ;;  %v3675_v50 = vld [vmem:[%s3094_s11 + $0xf0] sm:$0xff]  ;;  %v3682_v27 = vld [vmem:[%s3094_s11 + $0x2a0] sm:$0xff] }
  0x5d   : > { %v767_v54 = vadd.f32 %v735_v23, %v666_v37  ;;  %v937_v33 = vmul.f32 %v3642_v41, %v3140_v42  ;;  %v1037_v31 = vmul.f32 %v3536_v21, %v3149_v47  ;;  %v1038_v9 = vmul.f32 %v3651_v61, %v3149_v47  ;;  %v3685_v20 = vld [vmem:[%s3094_s11 + $0x950] sm:$0xff] }
  0x5e   : > { %v1977_v17 = vld [vmem:[#allocation2 + $0x8] sm:$0xff]  ;;  %v1689_v49 = vadd.f32 %v1657_v10, %v1588_v1  ;;  %v1690_v2 = vadd.f32 %v1658_v14, %v1589_v43  ;;  %v867_v39 = vadd.f32 %v835_v59, %v766_v58  ;;  %v1138_v3 = vmul.f32 %v3157_v52, %v3576_v46  ;;  %v3699_v58 = vld [vmem:[%s3094_s11 + $0x9e0] sm:$0xff] }
  0x5f   : > { %2919 = vmatmul.mubr.msk.bf16.vlgmr.msra.gmra.mrb[0].mxu0 %vm1959_vm0, %v1977_v17  ;;  %v868_v7 = vadd.f32 %v836_v38, %v767_v54  ;;  %v1139_v21 = vmul.f32 %v3667_v18, %v3157_v52  ;;  %v1239_v10 = vmul.f32 %v3583_v24, %v3160_v53  ;;  %v1240_v40 = vmul.f32 %v3675_v50, %v3160_v53  ;;  %v3692_v24 = vld [vmem:[%s3094_s11 + $0x330] sm:$0xff] }
  0x60   : > { %v1790_v14 = vadd.f32 %v1758_v19, %v1689_v49  ;;  %v1791_v26 = vadd.f32 %v1759_v25, %v1690_v2  ;;  %v968_v23 = vadd.f32 %v936_v35, %v867_v39  ;;  %v1340_v59 = vmul.f32 %v3586_v32, %v3174_v0  ;;  %v3702_v35 = vld [vmem:[%s3094_s11 + $0xb90] sm:$0xff]  ;;  %v3715_v49 = vld [vmem:[%s3094_s11 + $0xc20] sm:$0xff] }
  0x61   : > { %v969_v46 = vadd.f32 %v937_v33, %v868_v7  ;;  %v1341_v37 = vmul.f32 %v3682_v27, %v3174_v0  ;;  %v1441_v19 = vmul.f32 %v3599_v57, %v3182_v4  ;;  %v1442_v43 = vmul.f32 %v3692_v24, %v3182_v4 }
  0x62   : > { %v1891_v25 = vadd.f32 %v1859_v48, %v1790_v14  ;;  %v1892_v38 = vadd.f32 %v1860_v34, %v1791_v26  ;;  %v1069_v1 = vadd.f32 %v1037_v31, %v968_v23  ;;  %v1542_v54 = vmul.f32 %v3613_v13, %v3187_v5 }
  0x63   : > { %v1070_v32 = vadd.f32 %v1038_v9, %v969_v46  ;;  %v346_v33 = vmul.f32 %v3551_v45, %v3083_v11  ;;  %v347_v57 = vmul.f32 %v3083_v11, %v3685_v20  ;;  %v447_v17 = vmul.f32 %v3559_v51, %v3085_v12 }
  0x64   : > { %v1929_v48 = vadd.f32 %v3368_v55, %v1891_v25  ;;  %v1930_v34 = vadd.f32 %v3368_v55, %v1892_v38  ;;  %v1170_v31 = vadd.f32 %v1138_v3, %v1069_v1  ;;  %v448_v13 = vmul.f32 %v3699_v58, %v3085_v12  ;;  %v3724_v3 = vld [vmem:[%s3094_s11 + $0x180] sm:$0xff]  ;;  %v3737_v25 = vld [vmem:[%s3094_s11 + $0x210] sm:$0xff] }
  0x65   : > { %v1171_v2 = vadd.f32 %v1139_v21, %v1070_v32  ;;  %v548_v45 = vmul.f32 %v3566_v62, %v3098_v15  ;;  %v549_v39 = vmul.f32 %v3702_v35, %v3098_v15  ;;  %v479_v14 = vadd.f32 %v447_v17, %v346_v33  ;;  %v3729_v21 = vld [vmem:[%s3094_s11 + $0xa70] sm:$0xff]  ;;  %v3744_v1 = vld [vmem:[%s3094_s11 + $0xb00] sm:$0xff] }
  0x66   : > { %v1952_v9 = vpack.c.bf16 %v1930_v34, %v1929_v48  ;;  %v1271_v7 = vadd.f32 %v1239_v10, %v1170_v31  ;;  %v649_v51 = vmul.f32 %v3573_v44, %v3102_v16  ;;  %v1543_v23 = vmul.f32 %v3724_v3, %v3187_v5  ;;  %v3751_v34 = vld [vmem:[%s3094_s11 + $0x3c0] sm:$0xff]  ;;  %v3758_v17 = vld [vmem:[%s3094_s11 + $0xcb0] sm:$0xff] }
  0x67   : > { %v1272_v26 = vadd.f32 %v1240_v40, %v1171_v2  ;;  %v480_v62 = vadd.f32 %v448_v13, %v347_v57  ;;  %v650_v46 = vmul.f32 %v3715_v49, %v3102_v16  ;;  %v1643_v44 = vmul.f32 %v3628_v8, %v3192_v6 }
  0x68   : > { %1969 = vst.msk [vmem:[#allocation2 + $0x48] sm:$0xff] %vm1959_vm0, %v1952_v9  ;;  %v1372_v10 = vadd.f32 %v1340_v59, %v1271_v7  ;;  %v580_v38 = vadd.f32 %v548_v45, %v479_v14  ;;  %v750_v40 = vmul.f32 %v3608_v60, %v3122_v29  ;;  %v1644_v33 = vmul.f32 %v3737_v25, %v3192_v6  ;;  %v3765_v45 = vld [vmem:[%s3094_s11 + $0xd40] sm:$0xff]  ;;  %v3768_v9 = vld [vmem:[%s3094_s11 + $0x450] sm:$0xff] }
  0x69   : > { %v1373_v32 = vadd.f32 %v1341_v37, %v1272_v26  ;;  %v581_v57 = vadd.f32 %v549_v39, %v480_v62  ;;  %v751_v59 = vmul.f32 %v3729_v21, %v3122_v29  ;;  %v1744_v8 = vmul.f32 %v3642_v41, %v3228_v28 }
  0x6a   : > { %v1473_v48 = vadd.f32 %v1441_v19, %v1372_v10  ;;  %v681_v31 = vadd.f32 %v649_v51, %v580_v38  ;;  %v851_v60 = vmul.f32 %v3623_v63, %v3132_v36  ;;  %v1745_v2 = vmul.f32 %v3751_v34, %v3228_v28  ;;  %v3783_v10 = vld [vmem:[%s3094_s11 + $0x960] sm:$0xff] }
  0x6b   : > { %v1474_v37 = vadd.f32 %v1442_v43, %v1373_v32  ;;  %v682_v13 = vadd.f32 %v650_v46, %v581_v57  ;;  %v852_v19 = vmul.f32 %v3744_v1, %v3132_v36  ;;  %v1845_v41 = vmul.f32 %v3651_v61, %v3265_v56  ;;  %v3790_v32 = vld [vmem:[%s3094_s11 + $0x9f0] sm:$0xff] }
  0x6c   : > { %v1574_v39 = vadd.f32 %v1542_v54, %v1473_v48  ;;  %v782_v63 = vadd.f32 %v750_v40, %v681_v31  ;;  %v952_v43 = vmul.f32 %v3637_v22, %v3140_v42  ;;  %v1846_v14 = vmul.f32 %v3768_v9, %v3265_v56  ;;  %v3798_v48 = vld [vmem:[%s3094_s11 + $0xba0] sm:$0xff] }
  0x6d   : > { %v1575_v7 = vadd.f32 %v1543_v23, %v1474_v37  ;;  %v783_v51 = vadd.f32 %v751_v59, %v682_v13  ;;  %v953_v26 = vmul.f32 %v3758_v17, %v3140_v42  ;;  %v1053_v46 = vmul.f32 %v3654_v30, %v3149_v47  ;;  %v3805_v13 = vld [vmem:[%s3094_s11 + $0xc30] sm:$0xff] }
  0x6e   : > { %v1675_v62 = vadd.f32 %v1643_v44, %v1574_v39  ;;  %v883_v54 = vadd.f32 %v851_v60, %v782_v63  ;;  %v1054_v61 = vmul.f32 %v3765_v45, %v3149_v47  ;;  %v1154_v40 = vmul.f32 %v3157_v52, %v3685_v20  ;;  %v3815_v63 = vld [vmem:[%s3094_s11 + $0x100] sm:$0xff] }
  0x6f   : > { %v1985_v22 = vld [vmem:[#allocation2 + $0x48] sm:$0xff]  ;;  %v1676_v23 = vadd.f32 %v1644_v33, %v1575_v7  ;;  %v884_v38 = vadd.f32 %v852_v19, %v783_v51  ;;  %v1155_v44 = vmul.f32 %v3783_v10, %v3157_v52  ;;  %v1255_v59 = vmul.f32 %v3699_v58, %v3160_v53 }
  0x70   : > { %2935 = vmatmul.mubr.msk.bf16.vlgmr.msra.gmra.mrb[0].mxu1 %vm1959_vm0, %v1985_v22  ;;  %v1776_v30 = vadd.f32 %v1744_v8, %v1675_v62  ;;  %v984_v57 = vadd.f32 %v952_v43, %v883_v54  ;;  %v1256_v33 = vmul.f32 %v3790_v32, %v3160_v53  ;;  %v1356_v60 = vmul.f32 %v3702_v35, %v3174_v0  ;;  %v3808_v8 = vld [vmem:[%s3094_s11 + $0x70] sm:$0xff]  ;;  %v3830_v54 = vld [vmem:[%s3094_s11 + $0x340] sm:$0xff] }
  0x71   : > { %v1777_v20 = vadd.f32 %v1745_v2, %v1676_v23  ;;  %v985_v31 = vadd.f32 %v953_v26, %v884_v38  ;;  %v1357_v37 = vmul.f32 %v3798_v48, %v3174_v0  ;;  %v1457_v39 = vmul.f32 %v3715_v49, %v3182_v4  ;;  %v3822_v26 = vld [vmem:[%s3094_s11 + $0x2b0] sm:$0xff] }
  0x72   : > { %v1877_v58 = vadd.f32 %v1845_v41, %v1776_v30  ;;  %v1085_v19 = vadd.f32 %v1053_v46, %v984_v57  ;;  %v1458_v2 = vmul.f32 %v3805_v13, %v3182_v4  ;;  %v1558_v7 = vmul.f32 %v3729_v21, %v3187_v5  ;;  %v3845_v57 = vld [vmem:[%s3094_s11 + $0xa80] sm:$0xff] }
  0x73   : > { %v1878_v43 = vadd.f32 %v1846_v14, %v1777_v20  ;;  %v1086_v35 = vadd.f32 %v1054_v61, %v985_v31  ;;  %v332_v51 = vmul.f32 %v3667_v18, %v3083_v11  ;;  %v333_v62 = vmul.f32 %v3083_v11, %v3808_v8 }
  0x74   : > { %v1915_v41 = vadd.f32 %v3368_v55, %v1877_v58  ;;  %v1186_v49 = vadd.f32 %v1154_v40, %v1085_v19  ;;  %v433_v14 = vmul.f32 %v3675_v50, %v3085_v12  ;;  %v434_v18 = vmul.f32 %v3815_v63, %v3085_v12  ;;  %v3842_v40 = vld [vmem:[%s3094_s11 + $0x190] sm:$0xff]  ;;  %v3854_v19 = vld [vmem:[%s3094_s11 + $0x220] sm:$0xff] }
  0x75   : > { %v1916_v21 = vadd.f32 %v3368_v55, %v1878_v43  ;;  %v1187_v46 = vadd.f32 %v1155_v44, %v1086_v35  ;;  %v534_v61 = vmul.f32 %v3682_v27, %v3098_v15  ;;  %v535_v38 = vmul.f32 %v3822_v26, %v3098_v15  ;;  %v3858_v43 = vld [vmem:[%s3094_s11 + $0xb10] sm:$0xff] }
  0x76   : > { %v1287_v22 = vadd.f32 %v1255_v59, %v1186_v49  ;;  %v465_v23 = vadd.f32 %v433_v14, %v332_v51  ;;  %v635_v50 = vmul.f32 %v3692_v24, %v3102_v16  ;;  %v466_v20 = vadd.f32 %v434_v18, %v333_v62 }
  0x77   : > { %v1945_v30 = vpack.c.bf16 %v1916_v21, %v1915_v41  ;;  %v1288_v44 = vadd.f32 %v1256_v33, %v1187_v46  ;;  %v636_v31 = vmul.f32 %v3830_v54, %v3102_v16  ;;  %v1559_v59 = vmul.f32 %v3845_v57, %v3187_v5  ;;  %v3872_v21 = vld [vmem:[%s3094_s11 + $0xcc0] sm:$0xff] }
  0x78   : > { %v1388_v27 = vadd.f32 %v1356_v60, %v1287_v22  ;;  %v566_v58 = vadd.f32 %v534_v61, %v465_v23  ;;  %v736_v24 = vmul.f32 %v3724_v3, %v3122_v29  ;;  %v1659_v35 = vmul.f32 %v3744_v1, %v3192_v6  ;;  %v3883_v23 = vld [vmem:[%s3094_s11 + $0x460] sm:$0xff] }
  0x79   : > { %1962 = vst.msk [vmem:[#allocation2 + $0x10] sm:$0xff] %vm1959_vm0, %v1945_v30  ;;  %v1389_v33 = vadd.f32 %v1357_v37, %v1288_v44  ;;  %v567_v51 = vadd.f32 %v535_v38, %v466_v20  ;;  %v737_v60 = vmul.f32 %v3842_v40, %v3122_v29  ;;  %v1660_v3 = vmul.f32 %v3858_v43, %v3192_v6  ;;  %v3869_v37 = vld [vmem:[%s3094_s11 + $0x3d0] sm:$0xff]  ;;  %v2617_v30 = vld [vmem:[%s3094_s11 + $0x80] sm:$0xff] }
  0x7a   : > { %v1489_v41 = vadd.f32 %v1457_v39, %v1388_v27  ;;  %v667_v49 = vadd.f32 %v635_v50, %v566_v58  ;;  %v837_v62 = vmul.f32 %v3737_v25, %v3132_v36  ;;  %v1760_v1 = vmul.f32 %v3758_v17, %v3228_v28  ;;  %v3886_v38 = vld [vmem:[%s3094_s11 + $0xd50] sm:$0xff] }
  0x7b   : > { %v1490_v14 = vadd.f32 %v1458_v2, %v1389_v33  ;;  %v668_v46 = vadd.f32 %v636_v31, %v567_v51  ;;  %v838_v39 = vmul.f32 %v3854_v19, %v3132_v36  ;;  %v1761_v61 = vmul.f32 %v3872_v21, %v3228_v28  ;;  %v2649_v27 = vld [vmem:[%s3094_s11 + $0x110] sm:$0xff]  ;;  %v2681_v33 = vld [vmem:[%s3094_s11 + $0x2c0] sm:$0xff] }
  0x7c   : > { %v1590_v18 = vadd.f32 %v1558_v7, %v1489_v41  ;;  %v768_v22 = vadd.f32 %v736_v24, %v667_v49  ;;  %v938_v25 = vmul.f32 %v3751_v34, %v3140_v42  ;;  %v1861_v17 = vmul.f32 %v3765_v45, %v3265_v56  ;;  %v2713_v49 = vld [vmem:[%s3094_s11 + $0x350] sm:$0xff] }
  0x7d   : > { %v1591_v2 = vadd.f32 %v1559_v59, %v1490_v14  ;;  %v769_v50 = vadd.f32 %v737_v60, %v668_v46  ;;  %v939_v7 = vmul.f32 %v3869_v37, %v3140_v42  ;;  %v1862_v20 = vmul.f32 %v3886_v38, %v3265_v56  ;;  %v3912_v46 = vld [vmem:[%s3094_s11 + $0x970] sm:$0xff] }
  0x7e   : > { %v1691_v44 = vadd.f32 %v1659_v35, %v1590_v18  ;;  %v869_v34 = vadd.f32 %v837_v62, %v768_v22  ;;  %v1039_v31 = vmul.f32 %v3768_v9, %v3149_v47  ;;  %v1040_v45 = vmul.f32 %v3883_v23, %v3149_v47  ;;  %v3918_v22 = vld [vmem:[%s3094_s11 + $0xa00] sm:$0xff] }
  0x7f   : > { %v1692_v59 = vadd.f32 %v1660_v3, %v1591_v2  ;;  %v870_v58 = vadd.f32 %v838_v39, %v769_v50  ;;  %v1140_v24 = vmul.f32 %v3157_v52, %v3808_v8  ;;  %v1141_v41 = vmul.f32 %v2617_v30, %v3157_v52  ;;  %v3924_v50 = vld [vmem:[%s3094_s11 + $0xbb0] sm:$0xff] }
  0x80   : > { %v1978_v51 = vld [vmem:[#allocation2 + $0x10] sm:$0xff]  ;;  %v1792_v35 = vadd.f32 %v1760_v1, %v1691_v44  ;;  %v970_v60 = vadd.f32 %v938_v25, %v869_v34  ;;  %v1241_v9 = vmul.f32 %v3815_v63, %v3160_v53  ;;  %v1242_v14 = vmul.f32 %v2649_v27, %v3160_v53  ;;  %v2745_v34 = vld [vmem:[%s3094_s11 + $0x1a0] sm:$0xff] }
  0x81   : > { %2922 = vmatprep.mubr.msk.bf16.mxu0 %vm1959_vm0, %v1978_v51  ;;  %v1793_v3 = vadd.f32 %v1761_v61, %v1692_v59  ;;  %v971_v62 = vadd.f32 %v939_v7, %v870_v58  ;;  %v1342_v8 = vmul.f32 %v3822_v26, %v3174_v0  ;;  %v1343_v18 = vmul.f32 %v2681_v33, %v3174_v0  ;;  %v3938_v27 = vld [vmem:[%s3094_s11 + $0xc40] sm:$0xff]  ;;  %v2777_v51 = vld [vmem:[%s3094_s11 + $0x230] sm:$0xff] }
  0x82   : > { %v1893_v1 = vadd.f32 %v1861_v17, %v1792_v35  ;;  %v1071_v39 = vadd.f32 %v1039_v31, %v970_v60  ;;  %v1443_v63 = vmul.f32 %v3830_v54, %v3182_v4  ;;  %v1444_v2 = vmul.f32 %v2713_v49, %v3182_v4 }
  0x83   : > { %v1894_v61 = vadd.f32 %v1862_v20, %v1793_v3  ;;  %v1072_v25 = vadd.f32 %v1040_v45, %v971_v62  ;;  %v1544_v26 = vmul.f32 %v3842_v40, %v3187_v5  ;;  %v348_v54 = vmul.f32 %v3783_v10, %v3083_v11  ;;  %v3956_v3 = vld [vmem:[%s3094_s11 + $0xb20] sm:$0xff] }
  0x84   : > { %v1931_v17 = vadd.f32 %v3368_v55, %v1893_v1  ;;  %v1172_v7 = vadd.f32 %v1140_v24, %v1071_v39  ;;  %v349_v30 = vmul.f32 %v3083_v11, %v3912_v46  ;;  %v449_v40 = vmul.f32 %v3790_v32, %v3085_v12  ;;  %v3947_v24 = vld [vmem:[%s3094_s11 + $0xa90] sm:$0xff]  ;;  %v2809_v62 = vld [vmem:[%s3094_s11 + $0x3e0] sm:$0xff] }
  0x85   : > { %v1932_v44 = vadd.f32 %v3368_v55, %v1894_v61  ;;  %v1173_v20 = vadd.f32 %v1141_v41, %v1072_v25  ;;  %v450_v31 = vmul.f32 %v3918_v22, %v3085_v12  ;;  %v550_v10 = vmul.f32 %v3798_v48, %v3098_v15 }
  0x86   : > { %v1273_v59 = vadd.f32 %v1241_v9, %v1172_v7  ;;  %v551_v58 = vmul.f32 %v3924_v50, %v3098_v15  ;;  %v651_v45 = vmul.f32 %v3805_v13, %v3102_v16  ;;  %v481_v35 = vadd.f32 %v449_v40, %v348_v54  ;;  %v2841_v7 = vld [vmem:[%s3094_s11 + $0x470] sm:$0xff] }
  0x87   : > { %v1953_v32 = vpack.c.bf16 %v1932_v44, %v1931_v17  ;;  %v1274_v33 = vadd.f32 %v1242_v14, %v1173_v20  ;;  %v482_v60 = vadd.f32 %v450_v31, %v349_v30  ;;  %v1545_v9 = vmul.f32 %v2745_v34, %v3187_v5  ;;  %v3968_v17 = vld [vmem:[%s3094_s11 + $0xcd0] sm:$0xff]  ;;  %v3979_v34 = vld [vmem:[%s3094_s11 + $0xd60] sm:$0xff] }
  0x88   : > { %v1374_v41 = vadd.f32 %v1342_v8, %v1273_v59  ;;  %v652_v48 = vmul.f32 %v3938_v27, %v3102_v16  ;;  %v752_v49 = vmul.f32 %v3845_v57, %v3122_v29  ;;  %v582_v14 = vadd.f32 %v550_v10, %v481_v35  ;;  %v2633_v10 = vld [vmem:[%s3094_s11 + $0x980] sm:$0xff] }
  0x89   : > { %1970 = vst.msk [vmem:[#allocation2 + $0x50] sm:$0xff] %vm1959_vm0, %v1953_v32  ;;  %v1375_v13 = vadd.f32 %v1343_v18, %v1274_v33  ;;  %v583_v1 = vadd.f32 %v551_v58, %v482_v60  ;;  %v753_v8 = vmul.f32 %v3947_v24, %v3122_v29  ;;  %v1645_v61 = vmul.f32 %v3854_v19, %v3192_v6  ;;  %v2697_v60 = vld [vmem:[%s3094_s11 + $0xbc0] sm:$0xff] }
  0x8a   : > { %v1475_v39 = vadd.f32 %v1443_v63, %v1374_v41  ;;  %v1646_v25 = vmul.f32 %v2777_v51, %v3192_v6  ;;  %v853_v57 = vmul.f32 %v3858_v43, %v3132_v36  ;;  %v683_v54 = vadd.f32 %v651_v45, %v582_v14  ;;  %v2665_v45 = vld [vmem:[%s3094_s11 + $0xa10] sm:$0xff] }
  0x8b   : > { %v1476_v18 = vadd.f32 %v1444_v2, %v1375_v13  ;;  %v684_v30 = vadd.f32 %v652_v48, %v583_v1  ;;  %v854_v44 = vmul.f32 %v3956_v3, %v3132_v36  ;;  %v1746_v19 = vmul.f32 %v3869_v37, %v3228_v28 }
  0x8c   : > { %v1576_v63 = vadd.f32 %v1544_v26, %v1475_v39  ;;  %v1747_v20 = vmul.f32 %v2809_v62, %v3228_v28  ;;  %v954_v43 = vmul.f32 %v3872_v21, %v3140_v42  ;;  %v784_v40 = vadd.f32 %v752_v49, %v683_v54  ;;  %v2729_v49 = vld [vmem:[%s3094_s11 + $0xc50] sm:$0xff] }
  0x8d   : > { %v1577_v2 = vadd.f32 %v1545_v9, %v1476_v18  ;;  %v785_v31 = vadd.f32 %v753_v8, %v684_v30  ;;  %v955_v59 = vmul.f32 %v3968_v17, %v3140_v42  ;;  %v1847_v37 = vmul.f32 %v3883_v23, %v3265_v56  ;;  %v298_v8 = vld [vmem:[%s3094_s11 + $0x480] sm:$0xff]  ;;  %v4003_v39 = vld [vmem:[%s3094_s11 + $0x490] sm:$0xff] }
  0x8e   : > { %v1677_v26 = vadd.f32 %v1645_v61, %v1576_v63  ;;  %v1848_v58 = vmul.f32 %v2841_v7, %v3265_v56  ;;  %v1055_v21 = vmul.f32 %v3886_v38, %v3149_v47  ;;  %v885_v33 = vadd.f32 %v853_v57, %v784_v40  ;;  %v2394_v57 = vld [vmem:[%s3094_s11 + $0x510] sm:$0xff]  ;;  %v4012_v18 = vld [vmem:[%s3094_s11 + $0x520] sm:$0xff] }
  0x8f   : > { %v1678_v32 = vadd.f32 %v1646_v25, %v1577_v2  ;;  %v886_v51 = vadd.f32 %v854_v44, %v785_v31  ;;  %v1056_v35 = vmul.f32 %v3979_v34, %v3149_v47  ;;  %v1156_v23 = vmul.f32 %v3157_v52, %v3912_v46  ;;  %v2426_v63 = vld [vmem:[%s3094_s11 + $0x6c0] sm:$0xff] }
  0x90   : > { %v1986_v41 = vld [vmem:[#allocation2 + $0x50] sm:$0xff]  ;;  %v1778_v9 = vadd.f32 %v1746_v19, %v1677_v26  ;;  %v1157_v48 = vmul.f32 %v2633_v10, %v3157_v52  ;;  %v1257_v38 = vmul.f32 %v3918_v22, %v3160_v53  ;;  %v986_v62 = vadd.f32 %v954_v43, %v885_v33  ;;  %v2761_v10 = vld [vmem:[%s3094_s11 + $0xaa0] sm:$0xff] }
  0x91   : > { %2938 = vmatprep.mubr.msk.bf16.mxu1 %vm1959_vm0, %v1986_v41  ;;  %v1779_v13 = vadd.f32 %v1747_v20, %v1678_v32  ;;  %v987_v14 = vadd.f32 %v955_v59, %v886_v51  ;;  %v1258_v1 = vmul.f32 %v2665_v45, %v3160_v53  ;;  %v1358_v61 = vmul.f32 %v3924_v50, %v3174_v0  ;;  %v4017_v19 = vld [vmem:[%s3094_s11 + $0x6d0] sm:$0xff] }
  0x92   : > { %v1879_v46 = vadd.f32 %v1847_v37, %v1778_v9  ;;  %v1359_v22 = vmul.f32 %v2697_v60, %v3174_v0  ;;  %v1459_v25 = vmul.f32 %v3938_v27, %v3182_v4  ;;  %v1087_v54 = vadd.f32 %v1055_v21, %v986_v62  ;;  %v2458_v50 = vld [vmem:[%s3094_s11 + $0x750] sm:$0xff]  ;;  %v4030_v37 = vld [vmem:[%s3094_s11 + $0x760] sm:$0xff] }
  0x93   : > { %v1880_v7 = vadd.f32 %v1848_v58, %v1779_v13  ;;  %v1088_v30 = vadd.f32 %v1056_v35, %v987_v14  ;;  %v1460_v44 = vmul.f32 %v2729_v49, %v3182_v4  ;;  %v1560_v27 = vmul.f32 %v3947_v24, %v3187_v5  ;;  %v2793_v35 = vld [vmem:[%s3094_s11 + $0xb30] sm:$0xff]  ;;  %v2825_v14 = vld [vmem:[%s3094_s11 + $0xce0] sm:$0xff] }
  0x94   : > { %v1917_v20 = vadd.f32 %v3368_v55, %v1879_v46  ;;  %v334_v43 = vmul.f32 %v3083_v11, %v298_v8  ;;  %v335_v2 = vmul.f32 %v3083_v11, %v4003_v39  ;;  %v1188_v31 = vadd.f32 %v1156_v23, %v1087_v54  ;;  %v4041_v41 = vld [vmem:[%s3094_s11 + $0x5b0] sm:$0xff]  ;;  %v4053_v46 = vld [vmem:[%s3094_s11 + $0x640] sm:$0xff] }
  0x95   : > { %v1918_v40 = vadd.f32 %v3368_v55, %v1880_v7  ;;  %v1189_v59 = vadd.f32 %v1157_v48, %v1088_v30  ;;  %v435_v26 = vmul.f32 %v2394_v57, %v3085_v12  ;;  %v436_v24 = vmul.f32 %v4012_v18, %v3085_v12  ;;  %v2490_v55 = vld [vmem:[%s3094_s11 + $0x5a0] sm:$0xff]  ;;  %v2522_v13 = vld [vmem:[%s3094_s11 + $0x630] sm:$0xff] }
  0x96   : > { %v536_v58 = vmul.f32 %v2426_v63, %v3098_v15  ;;  %v537_v21 = vmul.f32 %v4017_v19, %v3098_v15  ;;  %v637_v45 = vmul.f32 %v2458_v50, %v3102_v16  ;;  %v1289_v33 = vadd.f32 %v1257_v38, %v1188_v31  ;;  %v2857_v63 = vld [vmem:[%s3094_s11 + $0xd70] sm:$0xff] }
  0x97   : > { %v1946_v32 = vpack.c.bf16 %v1918_v40, %v1917_v20  ;;  %v1290_v51 = vadd.f32 %v1258_v1, %v1189_v59  ;;  %v467_v60 = vadd.f32 %v435_v26, %v334_v43  ;;  %v1561_v9 = vmul.f32 %v2761_v10, %v3187_v5  ;;  %v4064_v43 = vld [vmem:[%s3094_s11 + $0x7f0] sm:$0xff]  ;;  %v4073_v10 = vld [vmem:[%s3094_s11 + $0x880] sm:$0xff] }
  0x98   : > { %v1661_v23 = vmul.f32 %v3956_v3, %v3192_v6  ;;  %v468_v48 = vadd.f32 %v436_v24, %v335_v2  ;;  %v638_v49 = vmul.f32 %v4030_v37, %v3102_v16  ;;  %v1390_v38 = vadd.f32 %v1358_v61, %v1289_v33  ;;  %v2554_v61 = vld [vmem:[%s3094_s11 + $0x7e0] sm:$0xff]  ;;  %v2586_v2 = vld [vmem:[%s3094_s11 + $0x870] sm:$0xff] }
  0x99   : > { %1963 = vst.msk [vmem:[#allocation2 + $0x18] sm:$0xff] %vm1959_vm0, %v1946_v32  ;;  %v1391_v62 = vadd.f32 %v1359_v22, %v1290_v51  ;;  %v568_v1 = vadd.f32 %v536_v58, %v467_v60  ;;  %v738_v8 = vmul.f32 %v2490_v55, %v3122_v29  ;;  %v1662_v3 = vmul.f32 %v2793_v35, %v3192_v6  ;;  %v4083_v51 = vld [vmem:[%s3094_s11 + $0x4a0] sm:$0xff] }
  0x9a   : > { %v1762_v57 = vmul.f32 %v3968_v17, %v3228_v28  ;;  %v569_v7 = vadd.f32 %v537_v21, %v468_v48  ;;  %v739_v54 = vmul.f32 %v4041_v41, %v3122_v29  ;;  %v1491_v30 = vadd.f32 %v1459_v25, %v1390_v38 }
  0x9b   : > { %v1492_v22 = vadd.f32 %v1460_v44, %v1391_v62  ;;  %v669_v50 = vadd.f32 %v637_v45, %v568_v1  ;;  %v839_v20 = vmul.f32 %v2522_v13, %v3132_v36  ;;  %v1763_v40 = vmul.f32 %v2825_v14, %v3228_v28  ;;  %v314_v1 = vld [vmem:[%s3094_s11 + $0xd80] sm:$0xff] }
  0x9c   : > { %v1863_v31 = vmul.f32 %v3979_v34, %v3265_v56  ;;  %v670_v17 = vadd.f32 %v638_v49, %v569_v7  ;;  %v840_v59 = vmul.f32 %v4053_v46, %v3132_v36  ;;  %v1592_v25 = vadd.f32 %v1560_v27, %v1491_v30  ;;  %v4109_v7 = vld [vmem:[%s3094_s11 + $0x770] sm:$0xff] }
  0x9d   : > { %v1593_v44 = vadd.f32 %v1561_v9, %v1492_v22  ;;  %v770_v26 = vadd.f32 %v738_v8, %v669_v50  ;;  %v940_v24 = vmul.f32 %v2554_v61, %v3140_v42  ;;  %v1864_v58 = vmul.f32 %v2857_v63, %v3265_v56  ;;  %v4102_v8 = vld [vmem:[%s3094_s11 + $0xd90] sm:$0xff] }
  0x9e   : > { %v771_v21 = vadd.f32 %v739_v54, %v670_v17  ;;  %v941_v45 = vmul.f32 %v4064_v43, %v3140_v42  ;;  %v1041_v34 = vmul.f32 %v2586_v2, %v3149_v47  ;;  %v1693_v55 = vadd.f32 %v1661_v23, %v1592_v25  ;;  %v4090_v23 = vld [vmem:[%s3094_s11 + $0x530] sm:$0xff]  ;;  %v4132_v25 = vld [vmem:[%s4997_s2] ss:$0 sm:$0xff] }
  0x9f   : > { %v1694_v32 = vadd.f32 %v1662_v3, %v1593_v44  ;;  %v871_v33 = vadd.f32 %v839_v20, %v770_v26  ;;  %v1042_v27 = vmul.f32 %v4073_v10, %v3149_v47  ;;  %v1142_v9 = vmul.f32 %v3157_v52, %v4003_v39  ;;  %v4098_v39 = vld [vmem:[%s3094_s11 + $0x6e0] sm:$0xff]  ;;  %v2410_v61 = vld [vmem:[%s3094_s11 + $0xe10] sm:$0xff] }
  0xa0   : > { %v1979_v35 = vld [vmem:[#allocation2 + $0x18] sm:$0xff]  ;;  %v872_v60 = vadd.f32 %v840_v59, %v771_v21  ;;  %v1143_v48 = vmul.f32 %v4083_v51, %v3157_v52  ;;  %v1243_v49 = vmul.f32 %v4012_v18, %v3160_v53  ;;  %v1794_v13 = vadd.f32 %v1762_v57, %v1693_v55  ;;  %v4117_v20 = vld [vmem:[%s3094_s11 + $0xe20] sm:$0xff]  ;;  %v4121_v2 = vld [vmem:[%s3094_s11 + $0xfd0] sm:$0xff] }
  0xa1   : > { %2923 = vmatmul.mubr.msk.bf16.gmra.mrb[4].mxu0 %vm1959_vm0, %v1979_v35  ;;  %v1795_v38 = vadd.f32 %v1763_v40, %v1694_v32  ;;  %v972_v62 = vadd.f32 %v940_v24, %v871_v33  ;;  %v1244_v14 = vmul.f32 %v4090_v23, %v3160_v53  ;;  %v1344_v18 = vmul.f32 %v4017_v19, %v3174_v0  ;;  %v2442_v19 = vld [vmem:[%s3094_s11 + $0xfc0] sm:$0xff]  ;;  %v2474_v59 = vld [vmem:[%s3094_s11 + $0x1050] sm:$0xff] }
  0xa2   : > { %v973_v3 = vadd.f32 %v941_v45, %v872_v60  ;;  %v1345_v57 = vmul.f32 %v4098_v39, %v3174_v0  ;;  %v1445_v54 = vmul.f32 %v4030_v37, %v3182_v4  ;;  %v1895_v30 = vadd.f32 %v1863_v31, %v1794_v13  ;;  %v2506_v32 = vld [vmem:[%s3094_s11 + $0xea0] sm:$0xff]  ;;  %v4151_v13 = vld [vmem:[%s3094_s11 + $0xeb0] sm:$0xff] }
  0xa3   : > { %v1896_v22 = vadd.f32 %v1864_v58, %v1795_v38  ;;  %v1073_v63 = vadd.f32 %v1041_v34, %v972_v62  ;;  %v1446_v50 = vmul.f32 %v4109_v7, %v3182_v4  ;;  %v1546_v17 = vmul.f32 %v4041_v41, %v3187_v5  ;;  %v4138_v58 = vld [vmem:[%s3094_s11 + $0x1060] sm:$0xff] }
  0xa4   : > { %v1074_v40 = vadd.f32 %v1042_v27, %v973_v3  ;;  %v350_v37 = vmul.f32 %v3083_v11, %v314_v1  ;;  %v351_v31 = vmul.f32 %v3083_v11, %v4102_v8  ;;  %v1933_v44 = vadd.f32 %v4132_v25, %v1895_v30  ;;  %v4147_v35 = vld [vmem:[%s3094_s11 + $0x5c0] sm:$0xff]  ;;  %v2538_v3 = vld [vmem:[%s3094_s11 + $0xf30] sm:$0xff] }
  0xa5   : > { %v1934_v26 = vadd.f32 %v4132_v25, %v1896_v22  ;;  %v1174_v24 = vadd.f32 %v1142_v9, %v1073_v63  ;;  %v451_v41 = vmul.f32 %v2410_v61, %v3085_v12  ;;  %v452_v45 = vmul.f32 %v4117_v20, %v3085_v12  ;;  %v4160_v61 = vld [vmem:[%s3094_s11 + $0x650] sm:$0xff]  ;;  %v4166_v63 = vld [vmem:[%s3094_s11 + $0xf40] sm:$0xff] }
  0xa6   : > { %v1175_v21 = vadd.f32 %v1143_v48, %v1074_v40  ;;  %v552_v34 = vmul.f32 %v2442_v19, %v3098_v15  ;;  %v553_v55 = vmul.f32 %v4121_v2, %v3098_v15  ;;  %v653_v9 = vmul.f32 %v2474_v59, %v3102_v16 }
  0xa7   : > { %v1954_v33 = vpack.c.bf16 %v1934_v26, %v1933_v44  ;;  %v1275_v27 = vadd.f32 %v1243_v49, %v1174_v24  ;;  %v483_v60 = vadd.f32 %v451_v41, %v350_v37  ;;  %v1547_v38 = vmul.f32 %v4147_v35, %v3187_v5  ;;  %v4174_v44 = vld [vmem:[%s3094_s11 + $0x800] sm:$0xff] }
  0xa8   : > { %v1276_v48 = vadd.f32 %v1244_v14, %v1175_v21  ;;  %v484_v62 = vadd.f32 %v452_v45, %v351_v31  ;;  %v654_v1 = vmul.f32 %v4138_v58, %v3102_v16  ;;  %v1647_v30 = vmul.f32 %v4053_v46, %v3192_v6  ;;  %v2570_v31 = vld [vmem:[%s3094_s11 + $0x10e0] sm:$0xff] }
  0xa9   : > { %1971 = vst.msk [vmem:[#allocation2 + $0x58] sm:$0xff] %vm1959_vm0, %v1954_v33  ;;  %v1376_v49 = vadd.f32 %v1344_v18, %v1275_v27  ;;  %v584_v14 = vadd.f32 %v552_v34, %v483_v60  ;;  %v754_v22 = vmul.f32 %v2506_v32, %v3122_v29  ;;  %v1648_v40 = vmul.f32 %v4160_v61, %v3192_v6  ;;  %v4191_v33 = vld [vmem:[%s3094_s11 + $0x890] sm:$0xff] }
  0xaa   : > { %v1377_v19 = vadd.f32 %v1345_v57, %v1276_v48  ;;  %v585_v37 = vadd.f32 %v553_v55, %v484_v62  ;;  %v755_v18 = vmul.f32 %v4151_v13, %v3122_v29  ;;  %v1748_v46 = vmul.f32 %v4064_v43, %v3228_v28  ;;  %v4180_v57 = vld [vmem:[%s3094_s11 + $0x10f0] sm:$0xff]  ;;  %v4188_v55 = vld [vmem:[%s3094_s11 + $0x1180] sm:$0xff] }
  0xab   : > { %v1477_v59 = vadd.f32 %v1445_v54, %v1376_v49  ;;  %v685_v26 = vadd.f32 %v653_v9, %v584_v14  ;;  %v855_v24 = vmul.f32 %v2538_v3, %v3132_v36  ;;  %v1749_v21 = vmul.f32 %v4174_v44, %v3228_v28  ;;  %v2602_v54 = vld [vmem:[%s3094_s11 + $0x1170] sm:$0xff]  ;;  %v4204_v49 = vld [vmem:[%s3094_s11 + $0xda0] sm:$0xff] }
  0xac   : > { %v1478_v41 = vadd.f32 %v1446_v50, %v1377_v19  ;;  %v686_v45 = vadd.f32 %v654_v1, %v585_v37  ;;  %v856_v34 = vmul.f32 %v4166_v63, %v3132_v36  ;;  %v1849_v43 = vmul.f32 %v4073_v10, %v3265_v56  ;;  %v4211_v37 = vld [vmem:[%s3094_s11 + $0xe30] sm:$0xff] }
  0xad   : > { %v1578_v32 = vadd.f32 %v1546_v17, %v1477_v59  ;;  %v786_v27 = vadd.f32 %v754_v22, %v685_v26  ;;  %v956_v50 = vmul.f32 %v2570_v31, %v3140_v42  ;;  %v1850_v9 = vmul.f32 %v4191_v33, %v3265_v56  ;;  %v4219_v26 = vld [vmem:[%s3094_s11 + $0xfe0] sm:$0xff] }
  0xae   : > { %v1579_v60 = vadd.f32 %v1547_v38, %v1478_v41  ;;  %v787_v48 = vadd.f32 %v755_v18, %v686_v45  ;;  %v957_v62 = vmul.f32 %v4180_v57, %v3140_v42  ;;  %v1057_v3 = vmul.f32 %v2602_v54, %v3149_v47 }
  0xaf   : > { %v1679_v1 = vadd.f32 %v1647_v30, %v1578_v32  ;;  %v887_v17 = vadd.f32 %v855_v24, %v786_v27  ;;  %v1058_v10 = vmul.f32 %v4188_v55, %v3149_v47  ;;  %v1158_v19 = vmul.f32 %v3157_v52, %v4102_v8  ;;  %v4236_v27 = vld [vmem:[%s3094_s11 + $0x540] sm:$0xff] }
  0xb0   : > { %v1987_v14 = vld [vmem:[#allocation2 + $0x58] sm:$0xff]  ;;  %v1680_v38 = vadd.f32 %v1648_v40, %v1579_v60  ;;  %v888_v22 = vadd.f32 %v856_v34, %v787_v48  ;;  %v1159_v30 = vmul.f32 %v4204_v49, %v3157_v52  ;;  %v1259_v59 = vmul.f32 %v4117_v20, %v3160_v53  ;;  %v4226_v34 = vld [vmem:[%s3094_s11 + $0x1070] sm:$0xff] }
  0xb1   : > { %2939 = vmatmul.mubr.msk.bf16.gmra.mrb[4].mxu1 %vm1959_vm0, %v1987_v14  ;;  %v1780_v18 = vadd.f32 %v1748_v46, %v1679_v1  ;;  %v988_v31 = vadd.f32 %v956_v50, %v887_v17  ;;  %v1260_v40 = vmul.f32 %v4211_v37, %v3160_v53  ;;  %v1360_v41 = vmul.f32 %v4121_v2, %v3174_v0  ;;  %v4229_v46 = vld [vmem:[%s3094_s11 + $0x4b0] sm:$0xff]  ;;  %v4251_v17 = vld [vmem:[%s3094_s11 + $0x780] sm:$0xff] }
  0xb2   : > { %v1781_v8 = vadd.f32 %v1749_v21, %v1680_v38  ;;  %v989_v24 = vadd.f32 %v957_v62, %v888_v22  ;;  %v1361_v45 = vmul.f32 %v4219_v26, %v3174_v0  ;;  %v1461_v32 = vmul.f32 %v4138_v58, %v3182_v4  ;;  %v4243_v62 = vld [vmem:[%s3094_s11 + $0x6f0] sm:$0xff] }
  0xb3   : > { %v1881_v20 = vadd.f32 %v1849_v43, %v1780_v18  ;;  %v1089_v54 = vadd.f32 %v1057_v3, %v988_v31  ;;  %v1462_v21 = vmul.f32 %v4226_v34, %v3182_v4  ;;  %v1562_v60 = vmul.f32 %v4151_v13, %v3187_v5  ;;  %v4266_v31 = vld [vmem:[%s3094_s11 + $0xec0] sm:$0xff] }
  0xb4   : > { %v1882_v50 = vadd.f32 %v1850_v9, %v1781_v8  ;;  %v1090_v2 = vadd.f32 %v1058_v10, %v989_v24  ;;  %v336_v48 = vmul.f32 %v4083_v51, %v3083_v11  ;;  %v337_v1 = vmul.f32 %v3083_v11, %v4229_v46 }
  0xb5   : > { %v1919_v43 = vadd.f32 %v4132_v25, %v1881_v20  ;;  %v1190_v58 = vadd.f32 %v1158_v19, %v1089_v54  ;;  %v437_v9 = vmul.f32 %v4090_v23, %v3085_v12  ;;  %v438_v51 = vmul.f32 %v4236_v27, %v3085_v12  ;;  %v4263_v19 = vld [vmem:[%s3094_s11 + $0x5d0] sm:$0xff]  ;;  %v4275_v54 = vld [vmem:[%s3094_s11 + $0x660] sm:$0xff] }
  0xb6   : > { %v1920_v13 = vadd.f32 %v4132_v25, %v1882_v50  ;;  %v1191_v3 = vadd.f32 %v1159_v30, %v1090_v2  ;;  %v538_v10 = vmul.f32 %v4098_v39, %v3098_v15  ;;  %v539_v22 = vmul.f32 %v4243_v62, %v3098_v15  ;;  %v4279_v50 = vld [vmem:[%s3094_s11 + $0xf50] sm:$0xff] }
  0xb7   : > { %v1291_v14 = vadd.f32 %v1259_v59, %v1190_v58  ;;  %v469_v38 = vadd.f32 %v437_v9, %v336_v48  ;;  %v639_v23 = vmul.f32 %v4109_v7, %v3102_v16  ;;  %v470_v8 = vadd.f32 %v438_v51, %v337_v1 }
  0xb8   : > { %v1947_v18 = vpack.c.bf16 %v1920_v13, %v1919_v43  ;;  %v1292_v30 = vadd.f32 %v1260_v40, %v1191_v3  ;;  %v640_v24 = vmul.f32 %v4251_v17, %v3102_v16  ;;  %v1563_v59 = vmul.f32 %v4266_v31, %v3187_v5  ;;  %v4293_v13 = vld [vmem:[%s3094_s11 + $0x1100] sm:$0xff] }
  0xb9   : > { %v1392_v39 = vadd.f32 %v1360_v41, %v1291_v14  ;;  %v570_v20 = vadd.f32 %v538_v10, %v469_v38  ;;  %v740_v7 = vmul.f32 %v4147_v35, %v3122_v29  ;;  %v1663_v2 = vmul.f32 %v4166_v63, %v3192_v6  ;;  %v4304_v38 = vld [vmem:[%s3094_s11 + $0x8a0] sm:$0xff] }
  0xba   : > { %1964 = vst.msk [vmem:[#allocation2 + $0x20] sm:$0xff] %vm1959_vm0, %v1947_v18  ;;  %v1393_v40 = vadd.f32 %v1361_v45, %v1292_v30  ;;  %v571_v48 = vadd.f32 %v539_v22, %v470_v8  ;;  %v741_v41 = vmul.f32 %v4263_v19, %v3122_v29  ;;  %v1664_v35 = vmul.f32 %v4279_v50, %v3192_v6  ;;  %v4290_v45 = vld [vmem:[%s3094_s11 + $0x810] sm:$0xff] }
  0xbb   : > { %v1493_v43 = vadd.f32 %v1461_v32, %v1392_v39  ;;  %v671_v58 = vadd.f32 %v639_v23, %v570_v20  ;;  %v841_v1 = vmul.f32 %v4160_v61, %v3132_v36  ;;  %v1764_v63 = vmul.f32 %v4180_v57, %v3228_v28  ;;  %v4307_v22 = vld [vmem:[%s3094_s11 + $0x1190] sm:$0xff] }
  0xbc   : > { %v1494_v9 = vadd.f32 %v1462_v21, %v1393_v40  ;;  %v672_v3 = vadd.f32 %v640_v24, %v571_v48  ;;  %v842_v32 = vmul.f32 %v4275_v54, %v3132_v36  ;;  %v1765_v10 = vmul.f32 %v4293_v13, %v3228_v28  ;;  %v4327_v48 = vld [vmem:[%s3094_s11 + $0x550] sm:$0xff] }
  0xbd   : > { %v1594_v51 = vadd.f32 %v1562_v60, %v1493_v43  ;;  %v772_v14 = vadd.f32 %v740_v7, %v671_v58  ;;  %v942_v61 = vmul.f32 %v4174_v44, %v3140_v42  ;;  %v1865_v57 = vmul.f32 %v4188_v55, %v3265_v56  ;;  %v4335_v58 = vld [vmem:[%s3094_s11 + $0x700] sm:$0xff] }
  0xbe   : > { %v1595_v21 = vadd.f32 %v1563_v59, %v1494_v9  ;;  %v773_v23 = vadd.f32 %v741_v41, %v672_v3  ;;  %v943_v60 = vmul.f32 %v4290_v45, %v3140_v42  ;;  %v1866_v30 = vmul.f32 %v4307_v22, %v3265_v56  ;;  %v4320_v59 = vld [vmem:[%s3094_s11 + $0x4c0] sm:$0xff]  ;;  %v4340_v9 = vld [vmem:[%s3094_s11 + $0xdb0] sm:$0xff] }
  0xbf   : > { %v1695_v18 = vadd.f32 %v1663_v2, %v1594_v51  ;;  %v873_v8 = vadd.f32 %v841_v1, %v772_v14  ;;  %v1043_v44 = vmul.f32 %v4191_v33, %v3149_v47  ;;  %v1044_v55 = vmul.f32 %v4304_v38, %v3149_v47 }
  0xc0   : > { %v1696_v24 = vadd.f32 %v1664_v35, %v1595_v21  ;;  %v874_v39 = vadd.f32 %v842_v32, %v773_v23  ;;  %v1144_v20 = vmul.f32 %v3157_v52, %v4229_v46  ;;  %v1145_v33 = vmul.f32 %v4320_v59, %v3157_v52  ;;  %v4345_v32 = vld [vmem:[%s3094_s11 + $0x790] sm:$0xff] }
  0xc1   : > { %v1980_v7 = vld [vmem:[#allocation2 + $0x20] sm:$0xff]  ;;  %v1796_v40 = vadd.f32 %v1764_v63, %v1695_v18  ;;  %v974_v2 = vadd.f32 %v942_v61, %v873_v8  ;;  %v1245_v41 = vmul.f32 %v4236_v27, %v3160_v53  ;;  %v1246_v46 = vmul.f32 %v4327_v48, %v3160_v53 }
  0xc2   : > { %2926 = vmatprep.mubr.msk.bf16.mxu0 %vm1959_vm0, %v1980_v7  ;;  %v1797_v43 = vadd.f32 %v1765_v10, %v1696_v24  ;;  %v975_v35 = vadd.f32 %v943_v60, %v874_v39  ;;  %v1346_v1 = vmul.f32 %v4243_v62, %v3174_v0  ;;  %v1347_v27 = vmul.f32 %v4335_v58, %v3174_v0  ;;  %v4350_v10 = vld [vmem:[%s3094_s11 + $0xe40] sm:$0xff]  ;;  %v4379_v7 = vld [vmem:[%s3094_s11 + $0xed0] sm:$0xff] }
  0xc3   : > { %v1897_v63 = vadd.f32 %v1865_v57, %v1796_v40  ;;  %v1075_v3 = vadd.f32 %v1043_v44, %v974_v2  ;;  %v1447_v51 = vmul.f32 %v4251_v17, %v3182_v4  ;;  %v1448_v62 = vmul.f32 %v4345_v32, %v3182_v4  ;;  %v4357_v57 = vld [vmem:[%s3094_s11 + $0xff0] sm:$0xff]  ;;  %v4370_v24 = vld [vmem:[%s3094_s11 + $0x1080] sm:$0xff] }
  0xc4   : > { %v1898_v14 = vadd.f32 %v1866_v30, %v1797_v43  ;;  %v1076_v61 = vadd.f32 %v1044_v55, %v975_v35  ;;  %v1548_v21 = vmul.f32 %v4263_v19, %v3187_v5  ;;  %v352_v17 = vmul.f32 %v4204_v49, %v3083_v11  ;;  %v4382_v2 = vld [vmem:[%s3094_s11 + $0x5e0] sm:$0xff] }
  0xc5   : > { %v1935_v23 = vadd.f32 %v4132_v25, %v1897_v63  ;;  %v1176_v60 = vadd.f32 %v1144_v20, %v1075_v3  ;;  %v353_v18 = vmul.f32 %v3083_v11, %v4340_v9  ;;  %v453_v44 = vmul.f32 %v4211_v37, %v3085_v12  ;;  %v4391_v63 = vld [vmem:[%s3094_s11 + $0xf60] sm:$0xff]  ;;  %v4395_v3 = vld [vmem:[%s3094_s11 + $0x670] sm:$0xff] }
  0xc6   : > { %v1936_v30 = vadd.f32 %v4132_v25, %v1898_v14  ;;  %v1177_v8 = vadd.f32 %v1145_v33, %v1076_v61  ;;  %v454_v19 = vmul.f32 %v4350_v10, %v3085_v12  ;;  %v554_v55 = vmul.f32 %v4219_v26, %v3098_v15 }
  0xc7   : > { %v1277_v39 = vadd.f32 %v1245_v41, %v1176_v60  ;;  %v555_v49 = vmul.f32 %v4357_v57, %v3098_v15  ;;  %v655_v20 = vmul.f32 %v4226_v34, %v3102_v16  ;;  %v485_v33 = vadd.f32 %v453_v44, %v352_v17 }
  0xc8   : > { %v1955_v37 = vpack.c.bf16 %v1936_v30, %v1935_v23  ;;  %v1278_v40 = vadd.f32 %v1246_v46, %v1177_v8  ;;  %v486_v43 = vadd.f32 %v454_v19, %v353_v18  ;;  %v1549_v26 = vmul.f32 %v4382_v2, %v3187_v5  ;;  %v4409_v30 = vld [vmem:[%s3094_s11 + $0x820] sm:$0xff] }
  0xc9   : > { %v1378_v41 = vadd.f32 %v1346_v1, %v1277_v39  ;;  %v656_v35 = vmul.f32 %v4370_v24, %v3102_v16  ;;  %v756_v34 = vmul.f32 %v4266_v31, %v3122_v29  ;;  %v586_v14 = vadd.f32 %v554_v55, %v485_v33  ;;  %v4420_v55 = vld [vmem:[%s3094_s11 + $0x11a0] sm:$0xff] }
  0xca   : > { %1972 = vst.msk [vmem:[#allocation2 + $0x60] sm:$0xff] %vm1959_vm0, %v1955_v37  ;;  %v1379_v46 = vadd.f32 %v1347_v27, %v1278_v40  ;;  %v587_v61 = vadd.f32 %v555_v49, %v486_v43  ;;  %v757_v1 = vmul.f32 %v4379_v7, %v3122_v29  ;;  %v1649_v60 = vmul.f32 %v4275_v54, %v3192_v6  ;;  %v4406_v27 = vld [vmem:[%s3094_s11 + $0x1110] sm:$0xff] }
  0xcb   : > { %v1479_v23 = vadd.f32 %v1447_v51, %v1378_v41  ;;  %v1650_v31 = vmul.f32 %v4395_v3, %v3192_v6  ;;  %v857_v17 = vmul.f32 %v4279_v50, %v3132_v36  ;;  %v687_v8 = vadd.f32 %v655_v20, %v586_v14  ;;  %v4423_v49 = vld [vmem:[%s3094_s11 + $0x8b0] sm:$0xff] }
  0xcc   : > { %v1480_v18 = vadd.f32 %v1448_v62, %v1379_v46  ;;  %v688_v44 = vadd.f32 %v656_v35, %v587_v61  ;;  %v858_v51 = vmul.f32 %v4391_v63, %v3132_v36  ;;  %v1750_v54 = vmul.f32 %v4290_v45, %v3228_v28 }
  0xcd   : > { %v1580_v19 = vadd.f32 %v1548_v21, %v1479_v23  ;;  %v1751_v39 = vmul.f32 %v4409_v30, %v3228_v28  ;;  %v958_v50 = vmul.f32 %v4293_v13, %v3140_v42  ;;  %v788_v20 = vadd.f32 %v756_v34, %v687_v8  ;;  %v4436_v34 = vld [vmem:[%s3094_s11 + $0xdc0] sm:$0xff] }
  0xce   : > { %v1581_v62 = vadd.f32 %v1549_v26, %v1480_v18  ;;  %v789_v37 = vadd.f32 %v757_v1, %v688_v44  ;;  %v959_v21 = vmul.f32 %v4406_v27, %v3140_v42  ;;  %v1851_v45 = vmul.f32 %v4304_v38, %v3265_v56  ;;  %v4451_v18 = vld [vmem:[%s3094_s11 + $0x1000] sm:$0xff] }
  0xcf   : > { %v1681_v40 = vadd.f32 %v1649_v60, %v1580_v19  ;;  %v1852_v33 = vmul.f32 %v4423_v49, %v3265_v56  ;;  %v1059_v13 = vmul.f32 %v4307_v22, %v3149_v47  ;;  %v889_v41 = vadd.f32 %v857_v17, %v788_v20  ;;  %v4443_v22 = vld [vmem:[%s3094_s11 + $0xe50] sm:$0xff]  ;;  %v4468_v20 = vld [vmem:[%s3094_s11 + $0x560] sm:$0xff] }
  0xd0   : > { %v1682_v43 = vadd.f32 %v1650_v31, %v1581_v62  ;;  %v890_v26 = vadd.f32 %v858_v51, %v789_v37  ;;  %v1060_v35 = vmul.f32 %v4420_v55, %v3149_v47  ;;  %v1160_v38 = vmul.f32 %v3157_v52, %v4340_v9  ;;  %v4454_v9 = vld [vmem:[%s3094_s11 + $0x4d0] sm:$0xff] }
  0xd1   : > { %v1988_v46 = vld [vmem:[#allocation2 + $0x60] sm:$0xff]  ;;  %v1782_v14 = vadd.f32 %v1750_v54, %v1681_v40  ;;  %v1161_v61 = vmul.f32 %v4436_v34, %v3157_v52  ;;  %v1261_v1 = vmul.f32 %v4350_v10, %v3160_v53  ;;  %v990_v60 = vadd.f32 %v958_v50, %v889_v41  ;;  %v4461_v51 = vld [vmem:[%s3094_s11 + $0x1090] sm:$0xff] }
  0xd2   : > { %2942 = vmatprep.mubr.msk.bf16.mxu1 %vm1959_vm0, %v1988_v46  ;;  %v1783_v23 = vadd.f32 %v1751_v39, %v1682_v43  ;;  %v991_v31 = vadd.f32 %v959_v21, %v890_v26  ;;  %v1262_v17 = vmul.f32 %v4443_v22, %v3160_v53  ;;  %v1362_v44 = vmul.f32 %v4357_v57, %v3174_v0  ;;  %v4471_v37 = vld [vmem:[%s3094_s11 + $0x710] sm:$0xff]  ;;  %v4484_v41 = vld [vmem:[%s3094_s11 + $0x7a0] sm:$0xff] }
  0xd3   : > { %v1883_v8 = vadd.f32 %v1851_v45, %v1782_v14  ;;  %v1363_v10 = vmul.f32 %v4451_v18, %v3174_v0  ;;  %v1463_v19 = vmul.f32 %v4370_v24, %v3182_v4  ;;  %v1091_v39 = vadd.f32 %v1059_v13, %v990_v60 }
  0xd4   : > { %v1884_v54 = vadd.f32 %v1852_v33, %v1783_v23  ;;  %v1092_v50 = vadd.f32 %v1060_v35, %v991_v31  ;;  %v1464_v62 = vmul.f32 %v4461_v51, %v3182_v4  ;;  %v1564_v21 = vmul.f32 %v4379_v7, %v3187_v5  ;;  %v4498_v23 = vld [vmem:[%s3094_s11 + $0x5f0] sm:$0xff] }
  0xd5   : > { %v1921_v57 = vadd.f32 %v4132_v25, %v1883_v8  ;;  %v338_v40 = vmul.f32 %v4320_v59, %v3083_v11  ;;  %v339_v24 = vmul.f32 %v3083_v11, %v4454_v9  ;;  %v1192_v33 = vadd.f32 %v1160_v38, %v1091_v39  ;;  %v4508_v8 = vld [vmem:[%s3094_s11 + $0xf70] sm:$0xff] }
  0xd6   : > { %v1922_v45 = vadd.f32 %v4132_v25, %v1884_v54  ;;  %v1193_v13 = vadd.f32 %v1161_v61, %v1092_v50  ;;  %v439_v43 = vmul.f32 %v4327_v48, %v3085_v12  ;;  %v440_v26 = vmul.f32 %v4468_v20, %v3085_v12  ;;  %v4495_v48 = vld [vmem:[%s3094_s11 + $0xee0] sm:$0xff] }
  0xd7   : > { %v540_v7 = vmul.f32 %v4335_v58, %v3098_v15  ;;  %v541_v59 = vmul.f32 %v4471_v37, %v3098_v15  ;;  %v641_v35 = vmul.f32 %v4345_v32, %v3102_v16  ;;  %v1293_v14 = vadd.f32 %v1261_v1, %v1192_v33  ;;  %v4513_v50 = vld [vmem:[%s3094_s11 + $0x680] sm:$0xff] }
  0xd8   : > { %v1948_v46 = vpack.c.bf16 %v1922_v45, %v1921_v57  ;;  %v1294_v38 = vadd.f32 %v1262_v17, %v1193_v13  ;;  %v471_v61 = vadd.f32 %v439_v43, %v338_v40  ;;  %v1565_v60 = vmul.f32 %v4495_v48, %v3187_v5  ;;  %v4522_v45 = vld [vmem:[%s3094_s11 + $0x1120] sm:$0xff]  ;;  %v4527_v13 = vld [vmem:[%s3094_s11 + $0x830] sm:$0xff] }
  0xd9   : > { %v1665_v58 = vmul.f32 %v4391_v63, %v3192_v6  ;;  %v472_v31 = vadd.f32 %v440_v26, %v339_v24  ;;  %v642_v32 = vmul.f32 %v4484_v41, %v3102_v16  ;;  %v1394_v1 = vadd.f32 %v1362_v44, %v1293_v14 }
  0xda   : > { %1965 = vst.msk [vmem:[#allocation2 + $0x28] sm:$0xff] %vm1959_vm0, %v1948_v46  ;;  %v1395_v17 = vadd.f32 %v1363_v10, %v1294_v38  ;;  %v572_v54 = vadd.f32 %v540_v7, %v471_v61  ;;  %v742_v39 = vmul.f32 %v4382_v2, %v3122_v29  ;;  %v1666_v63 = vmul.f32 %v4508_v8, %v3192_v6 }
  0xdb   : > { %v1766_v57 = vmul.f32 %v4406_v27, %v3228_v28  ;;  %v573_v40 = vadd.f32 %v541_v59, %v472_v31  ;;  %v743_v44 = vmul.f32 %v4498_v23, %v3122_v29  ;;  %v1495_v10 = vadd.f32 %v1463_v19, %v1394_v1  ;;  %v4552_v1 = vld [vmem:[%s3094_s11 + $0x4e0] sm:$0xff] }
  0xdc   : > { %v1496_v24 = vadd.f32 %v1464_v62, %v1395_v17  ;;  %v673_v33 = vadd.f32 %v641_v35, %v572_v54  ;;  %v843_v2 = vmul.f32 %v4395_v3, %v3132_v36  ;;  %v1767_v43 = vmul.f32 %v4522_v45, %v3228_v28  ;;  %v4536_v62 = vld [vmem:[%s3094_s11 + $0x8c0] sm:$0xff]  ;;  %v4539_v35 = vld [vmem:[%s3094_s11 + $0x11b0] sm:$0xff] }
  0xdd   : > { %v1867_v27 = vmul.f32 %v4420_v55, %v3265_v56  ;;  %v674_v26 = vadd.f32 %v642_v32, %v573_v40  ;;  %v844_v19 = vmul.f32 %v4513_v50, %v3132_v36  ;;  %v1596_v7 = vadd.f32 %v1564_v21, %v1495_v10 }
  0xde   : > { %v1597_v59 = vadd.f32 %v1565_v60, %v1496_v24  ;;  %v774_v3 = vadd.f32 %v742_v39, %v673_v33  ;;  %v944_v46 = vmul.f32 %v4409_v30, %v3140_v42  ;;  %v1868_v14 = vmul.f32 %v4539_v35, %v3265_v56  ;;  %v4567_v24 = vld [vmem:[%s3094_s11 + $0x720] sm:$0xff] }
  0xdf   : > { %v775_v55 = vadd.f32 %v743_v44, %v674_v26  ;;  %v945_v38 = vmul.f32 %v4527_v13, %v3140_v42  ;;  %v1045_v61 = vmul.f32 %v4423_v49, %v3149_v47  ;;  %v1697_v31 = vadd.f32 %v1665_v58, %v1596_v7  ;;  %v4559_v49 = vld [vmem:[%s3094_s11 + $0x570] sm:$0xff] }
  0xe0   : > { %v1698_v21 = vadd.f32 %v1666_v63, %v1597_v59  ;;  %v875_v60 = vadd.f32 %v843_v2, %v774_v3  ;;  %v1046_v32 = vmul.f32 %v4536_v62, %v3149_v47  ;;  %v1146_v54 = vmul.f32 %v3157_v52, %v4454_v9  ;;  %v4570_v9 = vld [vmem:[%s3094_s11 + $0xdd0] sm:$0xff]  ;;  %v4584_v3 = vld [vmem:[%s3094_s11 + $0xe60] sm:$0xff] }
  0xe1   : > { %v1981_v30 = vld [vmem:[#allocation2 + $0x28] sm:$0xff]  ;;  %v876_v17 = vadd.f32 %v844_v19, %v775_v55  ;;  %v1147_v39 = vmul.f32 %v4552_v1, %v3157_v52  ;;  %v1247_v58 = vmul.f32 %v4468_v20, %v3160_v53  ;;  %v1798_v63 = vadd.f32 %v1766_v57, %v1697_v31  ;;  %v4577_v26 = vld [vmem:[%s3094_s11 + $0x7b0] sm:$0xff] }
  0xe2   : > { %2927 = vmatmul.mubr.msk.bf16.gmra.mrb[8].mxu0 %vm1959_vm0, %v1981_v30  ;;  %v1799_v40 = vadd.f32 %v1767_v43, %v1698_v21  ;;  %v976_v44 = vadd.f32 %v944_v46, %v875_v60  ;;  %v1248_v10 = vmul.f32 %v4559_v49, %v3160_v53  ;;  %v1348_v2 = vmul.f32 %v4471_v37, %v3174_v0  ;;  %v4587_v46 = vld [vmem:[%s3094_s11 + $0x1010] sm:$0xff]  ;;  %v4600_v21 = vld [vmem:[%s3094_s11 + $0x10a0] sm:$0xff] }
  0xe3   : > { %v977_v33 = vadd.f32 %v945_v38, %v876_v17  ;;  %v1349_v20 = vmul.f32 %v4567_v24, %v3174_v0  ;;  %v1449_v57 = vmul.f32 %v4484_v41, %v3182_v4  ;;  %v1899_v43 = vadd.f32 %v1867_v27, %v1798_v63 }
  0xe4   : > { %v1900_v19 = vadd.f32 %v1868_v14, %v1799_v40  ;;  %v1077_v7 = vadd.f32 %v1045_v61, %v976_v44  ;;  %v1450_v59 = vmul.f32 %v4577_v26, %v3182_v4  ;;  %v1550_v55 = vmul.f32 %v4498_v23, %v3187_v5 }
  0xe5   : > { %v1078_v37 = vadd.f32 %v1046_v32, %v977_v33  ;;  %v354_v38 = vmul.f32 %v4436_v34, %v3083_v11  ;;  %v355_v41 = vmul.f32 %v3083_v11, %v4570_v9  ;;  %v1937_v27 = vadd.f32 %v4132_v25, %v1899_v43  ;;  %v4622_v43 = vld [vmem:[%s3094_s11 + $0x690] sm:$0xff] }
  0xe6   : > { %v1938_v14 = vadd.f32 %v4132_v25, %v1900_v19  ;;  %v1178_v61 = vadd.f32 %v1146_v54, %v1077_v7  ;;  %v455_v31 = vmul.f32 %v4443_v22, %v3085_v12  ;;  %v456_v23 = vmul.f32 %v4584_v3, %v3085_v12  ;;  %v4609_v54 = vld [vmem:[%s3094_s11 + $0x600] sm:$0xff] }
  0xe7   : > { %v1179_v60 = vadd.f32 %v1147_v39, %v1078_v37  ;;  %v556_v34 = vmul.f32 %v4451_v18, %v3098_v15  ;;  %v557_v32 = vmul.f32 %v4587_v46, %v3098_v15  ;;  %v657_v22 = vmul.f32 %v4461_v51, %v3102_v16  ;;  %v4614_v39 = vld [vmem:[%s3094_s11 + $0xef0] sm:$0xff]  ;;  %v4629_v7 = vld [vmem:[%s3094_s11 + $0xf80] sm:$0xff] }
  0xe8   : > { %v1956_v30 = vpack.c.bf16 %v1938_v14, %v1937_v27  ;;  %v1279_v17 = vadd.f32 %v1247_v58, %v1178_v61  ;;  %v487_v63 = vadd.f32 %v455_v31, %v354_v38  ;;  %v1551_v44 = vmul.f32 %v4609_v54, %v3187_v5  ;;  %v4636_v14 = vld [vmem:[%s3094_s11 + $0x840] sm:$0xff]  ;;  %v4643_v31 = vld [vmem:[%s3094_s11 + $0x1130] sm:$0xff] }
  0xe9   : > { %v1280_v40 = vadd.f32 %v1248_v10, %v1179_v60  ;;  %v488_v18 = vadd.f32 %v456_v23, %v355_v41  ;;  %v658_v33 = vmul.f32 %v4600_v21, %v3102_v16  ;;  %v1651_v51 = vmul.f32 %v4513_v50, %v3192_v6 }
  0xea   : > { %1973 = vst.msk [vmem:[#allocation2 + $0x68] sm:$0xff] %vm1959_vm0, %v1956_v30  ;;  %v1380_v58 = vadd.f32 %v1348_v2, %v1279_v17  ;;  %v588_v19 = vadd.f32 %v556_v34, %v487_v63  ;;  %v758_v10 = vmul.f32 %v4495_v48, %v3122_v29  ;;  %v1652_v38 = vmul.f32 %v4622_v43, %v3192_v6  ;;  %v4650_v34 = vld [vmem:[%s3094_s11 + $0x11c0] sm:$0xff]  ;;  %v4653_v30 = vld [vmem:[%s3094_s11 + $0x8d0] sm:$0xff] }
  0xeb   : > { %v1381_v37 = vadd.f32 %v1349_v20, %v1280_v40  ;;  %v589_v41 = vadd.f32 %v557_v32, %v488_v18  ;;  %v759_v2 = vmul.f32 %v4614_v39, %v3122_v29  ;;  %v1752_v50 = vmul.f32 %v4527_v13, %v3228_v28 }
  0xec   : > { %v1481_v27 = vadd.f32 %v1449_v57, %v1380_v58  ;;  %v689_v61 = vadd.f32 %v657_v22, %v588_v19  ;;  %v859_v48 = vmul.f32 %v4508_v8, %v3132_v36  ;;  %v1753_v60 = vmul.f32 %v4636_v14, %v3228_v28  ;;  %v4668_v58 = vld [vmem:[%s3094_s11 + $0xde0] sm:$0xff] }
  0xed   : > { %v1482_v20 = vadd.f32 %v1450_v59, %v1381_v37  ;;  %v690_v23 = vadd.f32 %v658_v33, %v589_v41  ;;  %v860_v57 = vmul.f32 %v4629_v7, %v3132_v36  ;;  %v1853_v13 = vmul.f32 %v4536_v62, %v3265_v56  ;;  %v4675_v37 = vld [vmem:[%s3094_s11 + $0xe70] sm:$0xff] }
  0xee   : > { %v1582_v32 = vadd.f32 %v1550_v55, %v1481_v27  ;;  %v790_v8 = vadd.f32 %v758_v10, %v689_v61  ;;  %v960_v59 = vmul.f32 %v4522_v45, %v3140_v42  ;;  %v1854_v63 = vmul.f32 %v4653_v30, %v3265_v56  ;;  %v4683_v27 = vld [vmem:[%s3094_s11 + $0x1020] sm:$0xff] }
  0xef   : > { %v1583_v17 = vadd.f32 %v1551_v44, %v1482_v20  ;;  %v791_v22 = vadd.f32 %v759_v2, %v690_v23  ;;  %v961_v40 = vmul.f32 %v4643_v31, %v3140_v42  ;;  %v1061_v33 = vmul.f32 %v4539_v35, %v3149_v47  ;;  %v4690_v23 = vld [vmem:[%s3094_s11 + $0x10b0] sm:$0xff] }
  0xf0   : > { %v1683_v18 = vadd.f32 %v1651_v51, %v1582_v32  ;;  %v891_v55 = vadd.f32 %v859_v48, %v790_v8  ;;  %v1062_v62 = vmul.f32 %v4650_v34, %v3149_v47  ;;  %v1162_v10 = vmul.f32 %v3157_v52, %v4570_v9  ;;  %v4700_v8 = vld [vmem:[%s3094_s11 + $0x580] sm:$0xff] }
  0xf1   : > { %v1989_v45 = vld [vmem:[#allocation2 + $0x68] sm:$0xff]  ;;  %v1684_v44 = vadd.f32 %v1652_v38, %v1583_v17  ;;  %v892_v19 = vadd.f32 %v860_v57, %v791_v22  ;;  %v1163_v51 = vmul.f32 %v4668_v58, %v3157_v52  ;;  %v1263_v2 = vmul.f32 %v4584_v3, %v3160_v53 }
  0xf2   : > { %2943 = vmatmul.mubr.msk.bf16.gmra.mrb[8].mxu1 %vm1959_vm0, %v1989_v45  ;;  %v1784_v35 = vadd.f32 %v1752_v50, %v1683_v18  ;;  %v992_v41 = vadd.f32 %v960_v59, %v891_v55  ;;  %v1264_v38 = vmul.f32 %v4675_v37, %v3160_v53  ;;  %v1364_v48 = vmul.f32 %v4587_v46, %v3174_v0  ;;  %v4693_v50 = vld [vmem:[%s3094_s11 + $0x4f0] sm:$0xff]  ;;  %v4715_v55 = vld [vmem:[%s3094_s11 + $0x7c0] sm:$0xff] }
  0xf3   : > { %v1785_v9 = vadd.f32 %v1753_v60, %v1684_v44  ;;  %v993_v61 = vadd.f32 %v961_v40, %v892_v19  ;;  %v1365_v20 = vmul.f32 %v4683_v27, %v3174_v0  ;;  %v1465_v32 = vmul.f32 %v4600_v21, %v3182_v4  ;;  %v4707_v40 = vld [vmem:[%s3094_s11 + $0x730] sm:$0xff] }
  0xf4   : > { %v1885_v3 = vadd.f32 %v1853_v13, %v1784_v35  ;;  %v1093_v57 = vadd.f32 %v1061_v33, %v992_v41  ;;  %v1466_v60 = vmul.f32 %v4690_v23, %v3182_v4  ;;  %v1566_v17 = vmul.f32 %v4614_v39, %v3187_v5  ;;  %v4730_v41 = vld [vmem:[%s3094_s11 + $0xf00] sm:$0xff] }
  0xf5   : > { %v1886_v59 = vadd.f32 %v1854_v63, %v1785_v9  ;;  %v1094_v46 = vadd.f32 %v1062_v62, %v993_v61  ;;  %v340_v22 = vmul.f32 %v4552_v1, %v3083_v11  ;;  %v341_v18 = vmul.f32 %v3083_v11, %v4693_v50 }
  0xf6   : > { %v1923_v13 = vadd.f32 %v4132_v25, %v1885_v3  ;;  %v1194_v21 = vadd.f32 %v1162_v10, %v1093_v57  ;;  %v441_v63 = vmul.f32 %v4559_v49, %v3085_v12  ;;  %v442_v1 = vmul.f32 %v4700_v8, %v3085_v12  ;;  %v4727_v10 = vld [vmem:[%s3094_s11 + $0x610] sm:$0xff]  ;;  %v4739_v57 = vld [vmem:[%s3094_s11 + $0x6a0] sm:$0xff] }
  0xf7   : > { %v1924_v39 = vadd.f32 %v4132_v25, %v1886_v59  ;;  %v1195_v33 = vadd.f32 %v1163_v51, %v1094_v46  ;;  %v542_v62 = vmul.f32 %v4567_v24, %v3098_v15  ;;  %v543_v19 = vmul.f32 %v4707_v40, %v3098_v15  ;;  %v4743_v59 = vld [vmem:[%s3094_s11 + $0xf90] sm:$0xff] }
  0xf8   : > { %v1295_v45 = vadd.f32 %v1263_v2, %v1194_v21  ;;  %v473_v44 = vadd.f32 %v441_v63, %v340_v22  ;;  %v643_v49 = vmul.f32 %v4577_v26, %v3102_v16  ;;  %v474_v9 = vadd.f32 %v442_v1, %v341_v18 }
  0xf9   : > { %v1949_v35 = vpack.c.bf16 %v1924_v39, %v1923_v13  ;;  %v1296_v51 = vadd.f32 %v1264_v38, %v1195_v33  ;;  %v644_v61 = vmul.f32 %v4715_v55, %v3102_v16  ;;  %v1567_v2 = vmul.f32 %v4730_v41, %v3187_v5  ;;  %v4757_v39 = vld [vmem:[%s3094_s11 + $0x1140] sm:$0xff] }
  0xfa   : > { %v1396_v24 = vadd.f32 %v1364_v48, %v1295_v45  ;;  %v574_v3 = vadd.f32 %v542_v62, %v473_v44  ;;  %v744_v26 = vmul.f32 %v4609_v54, %v3122_v29  ;;  %v1667_v46 = vmul.f32 %v4629_v7, %v3192_v6  ;;  %v4768_v44 = vld [vmem:[%s3094_s11 + $0x8e0] sm:$0xff] }
  0xfb   : > { %1966 = vst.msk [vmem:[#allocation2 + $0x30] sm:$0xff] %vm1959_vm0, %v1949_v35  ;;  %v1397_v38 = vadd.f32 %v1365_v20, %v1296_v51  ;;  %v575_v22 = vadd.f32 %v543_v19, %v474_v9  ;;  %v745_v48 = vmul.f32 %v4727_v10, %v3122_v29  ;;  %v1668_v54 = vmul.f32 %v4743_v59, %v3192_v6  ;;  %v4754_v20 = vld [vmem:[%s3094_s11 + $0x850] sm:$0xff]  ;;  %v2625_v35 = vld [vmem:[%s3094_s11 + $0x500] sm:$0xff] }
  0xfc   : > { %v1497_v13 = vadd.f32 %v1465_v32, %v1396_v24  ;;  %v675_v21 = vadd.f32 %v643_v49, %v574_v3  ;;  %v845_v18 = vmul.f32 %v4622_v43, %v3132_v36  ;;  %v1768_v7 = vmul.f32 %v4643_v31, %v3228_v28  ;;  %v4771_v19 = vld [vmem:[%s3094_s11 + $0x11d0] sm:$0xff] }
  0xfd   : > { %v1498_v63 = vadd.f32 %v1466_v60, %v1397_v38  ;;  %v676_v33 = vadd.f32 %v644_v61, %v575_v22  ;;  %v846_v32 = vmul.f32 %v4739_v57, %v3132_v36  ;;  %v1769_v62 = vmul.f32 %v4757_v39, %v3228_v28  ;;  %v2657_v24 = vld [vmem:[%s3094_s11 + $0x590] sm:$0xff]  ;;  %v2689_v38 = vld [vmem:[%s3094_s11 + $0x740] sm:$0xff] }
  0xfe   : > { %v1598_v1 = vadd.f32 %v1566_v17, %v1497_v13  ;;  %v776_v45 = vadd.f32 %v744_v26, %v675_v21  ;;  %v946_v43 = vmul.f32 %v4636_v14, %v3140_v42  ;;  %v1869_v31 = vmul.f32 %v4650_v34, %v3265_v56  ;;  %v2721_v21 = vld [vmem:[%s3094_s11 + $0x7d0] sm:$0xff] }
  0xff   : > { %v1599_v60 = vadd.f32 %v1567_v2, %v1498_v63  ;;  %v777_v49 = vadd.f32 %v745_v48, %v676_v33  ;;  %v947_v17 = vmul.f32 %v4754_v20, %v3140_v42  ;;  %v1870_v9 = vmul.f32 %v4771_v19, %v3265_v56  ;;  %v4797_v33 = vld [vmem:[%s3094_s11 + $0xdf0] sm:$0xff] }
 0x100   : > { %v1699_v51 = vadd.f32 %v1667_v46, %v1598_v1  ;;  %v877_v14 = vadd.f32 %v845_v18, %v776_v45  ;;  %v1047_v61 = vmul.f32 %v4653_v30, %v3149_v47  ;;  %v1048_v34 = vmul.f32 %v4768_v44, %v3149_v47  ;;  %v4803_v45 = vld [vmem:[%s3094_s11 + $0xe80] sm:$0xff] }
 0x101   : > { %v1700_v2 = vadd.f32 %v1668_v54, %v1599_v60  ;;  %v878_v3 = vadd.f32 %v846_v32, %v777_v49  ;;  %v1148_v26 = vmul.f32 %v3157_v52, %v4693_v50  ;;  %v1149_v13 = vmul.f32 %v2625_v35, %v3157_v52  ;;  %v4809_v49 = vld [vmem:[%s3094_s11 + $0x1030] sm:$0xff] }
 0x102   : > { %v1982_v22 = vld [vmem:[#allocation2 + $0x30] sm:$0xff]  ;;  %v1800_v46 = vadd.f32 %v1768_v7, %v1699_v51  ;;  %v978_v48 = vadd.f32 %v946_v43, %v877_v14  ;;  %v1249_v30 = vmul.f32 %v4700_v8, %v3160_v53  ;;  %v1250_v63 = vmul.f32 %v2657_v24, %v3160_v53  ;;  %v2753_v14 = vld [vmem:[%s3094_s11 + $0x620] sm:$0xff] }
 0x103   : > { %2930 = vmatprep.mubr.msk.bf16.mxu0 %vm1959_vm0, %v1982_v22  ;;  %v1801_v54 = vadd.f32 %v1769_v62, %v1700_v2  ;;  %v979_v18 = vadd.f32 %v947_v17, %v878_v3  ;;  %v1350_v50 = vmul.f32 %v4707_v40, %v3174_v0  ;;  %v1351_v1 = vmul.f32 %v2689_v38, %v3174_v0  ;;  %v4823_v24 = vld [vmem:[%s3094_s11 + $0x10c0] sm:$0xff]  ;;  %v4832_v3 = vld [vmem:[%s3094_s11 + $0xf10] sm:$0xff] }
 0x104   : > { %v1901_v7 = vadd.f32 %v1869_v31, %v1800_v46  ;;  %v1079_v32 = vadd.f32 %v1047_v61, %v978_v48  ;;  %v1451_v8 = vmul.f32 %v4715_v55, %v3182_v4  ;;  %v1452_v60 = vmul.f32 %v2721_v21, %v3182_v4  ;;  %v4841_v48 = vld [vmem:[%s3094_s11 + $0xfa0] sm:$0xff] }
 0x105   : > { %v1902_v62 = vadd.f32 %v1870_v9, %v1801_v54  ;;  %v1080_v43 = vadd.f32 %v1048_v34, %v979_v18  ;;  %v1552_v40 = vmul.f32 %v4727_v10, %v3187_v5  ;;  %v356_v55 = vmul.f32 %v4668_v58, %v3083_v11 }
 0x106   : > { %v1939_v31 = vadd.f32 %v4132_v25, %v1901_v7  ;;  %v1180_v17 = vadd.f32 %v1148_v26, %v1079_v32  ;;  %v357_v35 = vmul.f32 %v3083_v11, %v4797_v33  ;;  %v457_v10 = vmul.f32 %v4675_v37, %v3085_v12  ;;  %v2785_v26 = vld [vmem:[%s3094_s11 + $0x6b0] sm:$0xff] }
 0x107   : > { %v1940_v51 = vadd.f32 %v4132_v25, %v1902_v62  ;;  %v1181_v9 = vadd.f32 %v1149_v13, %v1080_v43  ;;  %v458_v61 = vmul.f32 %v4803_v45, %v3085_v12  ;;  %v558_v58 = vmul.f32 %v4683_v27, %v3098_v15  ;;  %v2817_v13 = vld [vmem:[%s3094_s11 + $0x860] sm:$0xff]  ;;  %v2849_v32 = vld [vmem:[%s3094_s11 + $0x8f0] sm:$0xff] }
 0x108   : > { %v1281_v2 = vadd.f32 %v1249_v30, %v1180_v17  ;;  %v559_v11 = vmul.f32 %v4809_v49, %v3098_v15  ;;  %v659_v25 = vmul.f32 %v4690_v23, %v3102_v16  ;;  %v489_v12 = vadd.f32 %v457_v10, %v356_v55 }
 0x109   : > { %v1957_v37 = vpack.c.bf16 %v1940_v51, %v1939_v31  ;;  %v1282_v34 = vadd.f32 %v1250_v63, %v1181_v9  ;;  %v490_v38 = vadd.f32 %v458_v61, %v357_v35  ;;  %v1553_v46 = vmul.f32 %v2753_v14, %v3187_v5  ;;  %v2641_v9 = vld [vmem:[%s3094_s11 + $0xe00] sm:$0xff] }
 0x10a   : > { %v1382_v22 = vadd.f32 %v1350_v50, %v1281_v2  ;;  %v660_v27 = vmul.f32 %v4823_v24, %v3102_v16  ;;  %v760_v15 = vmul.f32 %v4730_v41, %v3122_v29  ;;  %v590_v30 = vadd.f32 %v558_v58, %v489_v12  ;;  %v4853_v50 = vld [vmem:[%s3094_s11 + $0x1150] sm:$0xff] }
 0x10b   : > { %1974 = vst.msk [vmem:[#allocation2 + $0x70] sm:$0xff] %vm1959_vm0, %v1957_v37  ;;  %v1383_v23 = vadd.f32 %v1351_v1, %v1282_v34  ;;  %v591_v21 = vadd.f32 %v559_v11, %v490_v38  ;;  %v761_v54 = vmul.f32 %v4832_v3, %v3122_v29  ;;  %v1653_v63 = vmul.f32 %v4739_v57, %v3192_v6  ;;  %v2673_v11 = vld [vmem:[%s3094_s11 + $0xe90] sm:$0xff] }
 0x10c   : > { %v1483_v18 = vadd.f32 %v1451_v8, %v1382_v22  ;;  %v1654_v16 = vmul.f32 %v2785_v26, %v3192_v6  ;;  %v861_v41 = vmul.f32 %v4743_v59, %v3132_v36  ;;  %v691_v1 = vadd.f32 %v659_v25, %v590_v30  ;;  %v2609_v59 = vld [vmem:[%s3094_s11 + $0x11e0] sm:$0xff] }
 0x10d   : > { %v1484_v7 = vadd.f32 %v1452_v60, %v1383_v23  ;;  %v692_v62 = vadd.f32 %v660_v27, %v591_v21  ;;  %v862_v43 = vmul.f32 %v4841_v48, %v3132_v36  ;;  %v1754_v8 = vmul.f32 %v4754_v20, %v3228_v28 }
 0x10e   : > { %v1584_v29 = vadd.f32 %v1552_v40, %v1483_v18  ;;  %v1755_v57 = vmul.f32 %v2817_v13, %v3228_v28  ;;  %v962_v31 = vmul.f32 %v4757_v39, %v3140_v42  ;;  %v792_v60 = vadd.f32 %v760_v15, %v691_v1  ;;  %v2737_v15 = vld [vmem:[%s3094_s11 + $0x10d0] sm:$0xff]  ;;  %v2833_v1 = vld [vmem:[%s3094_s11 + $0x1160] sm:$0xff] }
 0x10f   : > { %v1585_v17 = vadd.f32 %v1553_v46, %v1484_v7  ;;  %v793_v55 = vadd.f32 %v761_v54, %v692_v62  ;;  %v963_v35 = vmul.f32 %v4853_v50, %v3140_v42  ;;  %v1855_v36 = vmul.f32 %v4768_v44, %v3265_v56  ;;  %v2988_v46 = vld [vmem:[%s4997_s2] ss:$0 sm:$0xff] }
 0x110   : > { %v1685_v51 = vadd.f32 %v1653_v63, %v1584_v29  ;;  %v1856_v40 = vmul.f32 %v2849_v32, %v3265_v56  ;;  %v1063_v20 = vmul.f32 %v4771_v19, %v3149_v47  ;;  %v893_v14 = vadd.f32 %v861_v41, %v792_v60  ;;  %v2769_v54 = vld [vmem:[%s3094_s11 + $0xf20] sm:$0xff]  ;;  %v2801_v41 = vld [vmem:[%s3094_s11 + $0xfb0] sm:$0xff] }
 0x111   : > { %v1686_v39 = vadd.f32 %v1654_v16, %v1585_v17  ;;  %v894_v10 = vadd.f32 %v862_v43, %v793_v55  ;;  %v1064_v61 = vmul.f32 %v2609_v59, %v3149_v47  ;;  %v1164_v42 = vmul.f32 %v3157_v52, %v4797_v33  ;;  %v2705_v47 = vld [vmem:[%s3094_s11 + $0x1040] sm:$0xff] }
 0x112   : > { %v1990_v2 = vld [vmem:[#allocation2 + $0x70] sm:$0xff]  ;;  %v1786_v58 = vadd.f32 %v1754_v8, %v1685_v51  ;;  %v994_v25 = vadd.f32 %v962_v31, %v893_v14  ;;  %v1165_v19 = vmul.f32 %v2641_v9, %v3157_v52  ;;  %v1265_v26 = vmul.f32 %v4803_v45, %v3160_v53 }
 0x113   : > { %2946 = vmatprep.mubr.msk.bf16.mxu1 %vm1959_vm0, %v1990_v2  ;;  %v1787_v44 = vadd.f32 %v1755_v57, %v1686_v39  ;;  %v995_v37 = vadd.f32 %v963_v35, %v894_v10  ;;  %v1266_v33 = vmul.f32 %v2673_v11, %v3160_v53  ;;  %v1366_v52 = vmul.f32 %v4809_v49, %v3174_v0 }
 0x114   : > { %v1887_v34 = vadd.f32 %v1855_v36, %v1786_v58  ;;  %v1095_v38 = vadd.f32 %v1063_v20, %v994_v25  ;;  %v1367_v30 = vmul.f32 %v2705_v47, %v3174_v0  ;;  %v1467_v21 = vmul.f32 %v4823_v24, %v3182_v4 }
 0x115   : > { %v1888_v12 = vadd.f32 %v1856_v40, %v1787_v44  ;;  %v1096_v22 = vadd.f32 %v1064_v61, %v995_v37  ;;  %v1468_v16 = vmul.f32 %v2737_v15, %v3182_v4  ;;  %v1568_v32 = vmul.f32 %v4832_v3, %v3187_v5  ;;  %v2865_v4 = vld [vmem:[%s3094_s11 + $0x11f0] sm:$0xff] }
 0x116   : > { %v1925_v27 = vadd.f32 %v2988_v46, %v1887_v34  ;;  %v1196_v13 = vadd.f32 %v1164_v42, %v1095_v38  ;;  %v1569_v0 = vmul.f32 %v2769_v54, %v3187_v5  ;;  %v1669_v43 = vmul.f32 %v4841_v48, %v3192_v6 }
 0x117   : > { %v1926_v23 = vadd.f32 %v2988_v46, %v1888_v12  ;;  %v1197_v45 = vadd.f32 %v1165_v19, %v1096_v22  ;;  %v1670_v29 = vmul.f32 %v2801_v41, %v3192_v6  ;;  %v1770_v31 = vmul.f32 %v4853_v50, %v3228_v28 }
 0x118   : > { %v1297_v18 = vadd.f32 %v1265_v26, %v1196_v13  ;;  %v1771_v17 = vmul.f32 %v2833_v1, %v3228_v28  ;;  %v1871_v5 = vmul.f32 %v2609_v59, %v3265_v56  ;;  %v1872_v55 = vmul.f32 %v2865_v4, %v3265_v56  ;;  %v4914_v28 = vld [vmem:[%s4999_s4] ss:$0 sm:$0xff] }
 0x119   : > { %v1950_v53 = vpack.c.bf16 %v1926_v23, %v1925_v27  ;;  %v1298_v63 = vadd.f32 %v1266_v33, %v1197_v45 }
 0x11a   : > { %v1398_v49 = vadd.f32 %v1366_v52, %v1297_v18 }
 0x11b   : > { %1967 = vst.msk [vmem:[#allocation2 + $0x38] sm:$0xff] %vm1959_vm0, %v1950_v53  ;;  %v1399_v7 = vadd.f32 %v1367_v30, %v1298_v63 }
 0x11c   : > { %v1499_v62 = vadd.f32 %v1467_v21, %v1398_v49 }
 0x11d   : > { %v1500_v24 = vadd.f32 %v1468_v16, %v1399_v7 }
 0x11e   : > { %v1600_v8 = vadd.f32 %v1568_v32, %v1499_v62 }
 0x11f   : > { %v1601_v57 = vadd.f32 %v1569_v0, %v1500_v24 }
 0x120   : > { %v1701_v3 = vadd.f32 %v1669_v43, %v1600_v8 }
 0x121   : > { %v1702_v60 = vadd.f32 %v1670_v29, %v1601_v57 }
 0x122   : > { %v1983_v35 = vld [vmem:[#allocation2 + $0x38] sm:$0xff]  ;;  %v1802_v48 = vadd.f32 %v1770_v31, %v1701_v3 }
 0x123   : > { %2931 = vmatmul.mubr.msk.bf16.gmra.mrb[12].mxu0 %vm1959_vm0, %v1983_v35  ;;  %v1803_v51 = vadd.f32 %v1771_v17, %v1702_v60 }
 0x124   : > { %v1903_v6 = vadd.f32 %v1871_v5, %v1802_v48 }
 0x125   : > { %v1904_v36 = vadd.f32 %v1872_v55, %v1803_v51 }
 0x126   : > { %v1941_v40 = vadd.f32 %v2988_v46, %v1903_v6 }
 0x127   : > { %v1942_v20 = vadd.f32 %v2988_v46, %v1904_v36 }
 0x129   : > { %v1958_v50 = vpack.c.bf16 %v1942_v20, %v1941_v40 }
 0x12b   : > { %1975 = vst.msk [vmem:[#allocation2 + $0x78] sm:$0xff] %vm1959_vm0, %v1958_v50 }
 0x132   : > { %v1991_v56 = vld [vmem:[#allocation2 + $0x78] sm:$0xff]  ;;  %v2920_v59 = vpop.f32.mrb[0].mxu0 }
 0x133   : > { %2947 = vmatmul.mubr.msk.bf16.gmra.mrb[12].mxu1 %vm1959_vm0, %v1991_v56  ;;  %v2123_v9 = vadd.f32 %v2920_v59, %v4914_v28  ;;  %v2114_v39 = vpop.f32.mrb[1].mxu0 }
 0x134   : > { %v2115_v14 = vadd.f32 %v4914_v28, %v2114_v39  ;;  %v2921_v10 = vpop.f32.mrb[2].mxu0 }
 0x135   : > { %2243 = vst [vmem:[%s4919_s18 + $0x10] sm:$0xff] %v2123_v9  ;;  %v2126_v61 = vadd.f32 %v2921_v10, %v4914_v28  ;;  %v2117_v2 = vpop.f32.mrb[3].mxu0 }
 0x136   : > { %2241 = vst [vmem:[%s4919_s18] sm:$0xff] %v2115_v14  ;;  %v2118_v58 = vadd.f32 %v4914_v28, %v2117_v2 }
 0x137   : > { %2244 = vst [vmem:[%s4919_s18 + $0x18] sm:$0xff] %v2126_v61 }
 0x138   : > { %2242 = vst [vmem:[%s4919_s18 + $0x8] sm:$0xff] %v2118_v58 }
 0x143   : > { %v2936_v42 = vpop.f32.mrb[0].mxu1 }
 0x144   : > { %v2187_v11 = vadd.f32 %v2936_v42, %v4914_v28  ;;  %v2178_v44 = vpop.f32.mrb[1].mxu1 }
 0x145   : > { %v2179_v25 = vadd.f32 %v4914_v28, %v2178_v44  ;;  %v2937_v37 = vpop.f32.mrb[2].mxu1 }
 0x146   : > { %2259 = vst [vmem:[%s4919_s18 + $0x90] sm:$0xff] %v2187_v11  ;;  %v2190_v19 = vadd.f32 %v2937_v37, %v4914_v28  ;;  %v2181_v34 = vpop.f32.mrb[3].mxu1 }
 0x147   : > { %2257 = vst [vmem:[%s4919_s18 + $0x80] sm:$0xff] %v2179_v25  ;;  %v2182_v26 = vadd.f32 %v4914_v28, %v2181_v34 }
 0x148   : > { %2260 = vst [vmem:[%s4919_s18 + $0x98] sm:$0xff] %v2190_v19 }
 0x149   : > { %2258 = vst [vmem:[%s4919_s18 + $0x88] sm:$0xff] %v2182_v26 }
 0x174   : > { %v2924_v47 = vpop.f32.mrb[4].mxu0 }
 0x175   : > { %v2139_v12 = vadd.f32 %v2924_v47, %v4914_v28  ;;  %v2130_v38 = vpop.f32.mrb[5].mxu0 }
 0x176   : > { %v2131_v22 = vadd.f32 %v4914_v28, %v2130_v38  ;;  %v2925_v33 = vpop.f32.mrb[6].mxu0 }
 0x177   : > { %2247 = vst [vmem:[%s4919_s18 + $0x30] sm:$0xff] %v2139_v12  ;;  %v2142_v46 = vadd.f32 %v2925_v33, %v4914_v28  ;;  %v2133_v27 = vpop.f32.mrb[7].mxu0 }
 0x178   : > { %2245 = vst [vmem:[%s4919_s18 + $0x20] sm:$0xff] %v2131_v22  ;;  %v2134_v52 = vadd.f32 %v4914_v28, %v2133_v27 }
 0x179   : > { %2248 = vst [vmem:[%s4919_s18 + $0x38] sm:$0xff] %v2142_v46 }
 0x17a   : > { %2246 = vst [vmem:[%s4919_s18 + $0x28] sm:$0xff] %v2134_v52 }
 0x184   : > { %v2940_v15 = vpop.f32.mrb[4].mxu1 }
 0x185   : > { %v2203_v23 = vadd.f32 %v2940_v15, %v4914_v28  ;;  %v2194_v13 = vpop.f32.mrb[5].mxu1 }
 0x186   : > { %v2195_v45 = vadd.f32 %v4914_v28, %v2194_v13  ;;  %v2941_v30 = vpop.f32.mrb[6].mxu1 }
 0x187   : > { %2263 = vst [vmem:[%s4919_s18 + $0xb0] sm:$0xff] %v2203_v23  ;;  %v2206_v21 = vadd.f32 %v2941_v30, %v4914_v28  ;;  %v2197_v54 = vpop.f32.mrb[7].mxu1 }
 0x188   : > { %2261 = vst [vmem:[%s4919_s18 + $0xa0] sm:$0xff] %v2195_v45  ;;  %v2198_v53 = vadd.f32 %v4914_v28, %v2197_v54 }
 0x189   : > { %2264 = vst [vmem:[%s4919_s18 + $0xb8] sm:$0xff] %v2206_v21 }
 0x18a   : > { %2262 = vst [vmem:[%s4919_s18 + $0xa8] sm:$0xff] %v2198_v53 }
 0x1b5   : > { %v2928_v18 = vpop.f32.mrb[8].mxu0 }
 0x1b6   : > { %v2155_v63 = vadd.f32 %v2928_v18, %v4914_v28  ;;  %v2146_v16 = vpop.f32.mrb[9].mxu0 }
 0x1b7   : > { %v2147_v41 = vadd.f32 %v4914_v28, %v2146_v16  ;;  %v2929_v49 = vpop.f32.mrb[10].mxu0 }
 0x1b8   : > { %2251 = vst [vmem:[%s4919_s18 + $0x50] sm:$0xff] %v2155_v63  ;;  %v2158_v7 = vadd.f32 %v2929_v49, %v4914_v28  ;;  %v2149_v32 = vpop.f32.mrb[11].mxu0 }
 0x1b9   : > { %2249 = vst [vmem:[%s4919_s18 + $0x40] sm:$0xff] %v2147_v41  ;;  %v2150_v0 = vadd.f32 %v4914_v28, %v2149_v32 }
 0x1ba   : > { %2252 = vst [vmem:[%s4919_s18 + $0x58] sm:$0xff] %v2158_v7 }
 0x1bb   : > { %2250 = vst [vmem:[%s4919_s18 + $0x48] sm:$0xff] %v2150_v0 }
 0x1c5   : > { %v2944_v1 = vpop.f32.mrb[8].mxu1 }
 0x1c6   : > { %v2219_v62 = vadd.f32 %v2944_v1, %v4914_v28  ;;  %v2210_v24 = vpop.f32.mrb[9].mxu1 }
 0x1c7   : > { %v2211_v43 = vadd.f32 %v4914_v28, %v2210_v24  ;;  %v2945_v29 = vpop.f32.mrb[10].mxu1 }
 0x1c8   : > { %2267 = vst [vmem:[%s4919_s18 + $0xd0] sm:$0xff] %v2219_v62  ;;  %v2222_v4 = vadd.f32 %v2945_v29, %v4914_v28  ;;  %v2213_v8 = vpop.f32.mrb[11].mxu1 }
 0x1c9   : > { %2265 = vst [vmem:[%s4919_s18 + $0xc0] sm:$0xff] %v2211_v43  ;;  %v2214_v57 = vadd.f32 %v4914_v28, %v2213_v8 }
 0x1ca   : > { %2268 = vst [vmem:[%s4919_s18 + $0xd8] sm:$0xff] %v2222_v4 }
 0x1cb   : > { %2266 = vst [vmem:[%s4919_s18 + $0xc8] sm:$0xff] %v2214_v57 }
 0x1f6   : > { %v2932_v31 = vpop.f32.mrb[12].mxu0 }
 0x1f7   : > { %v2171_v17 = vadd.f32 %v2932_v31, %v4914_v28  ;;  %v2162_v3 = vpop.f32.mrb[13].mxu0 }
 0x1f8   : > { %v2163_v60 = vadd.f32 %v4914_v28, %v2162_v3  ;;  %v2933_v5 = vpop.f32.mrb[14].mxu0 }
 0x1f9   : > { %2255 = vst [vmem:[%s4919_s18 + $0x70] sm:$0xff] %v2171_v17  ;;  %v2174_v55 = vadd.f32 %v2933_v5, %v4914_v28  ;;  %v2165_v35 = vpop.f32.mrb[15].mxu0 }
 0x1fa   : > { %2253 = vst [vmem:[%s4919_s18 + $0x60] sm:$0xff] %v2163_v60  ;;  %v2166_v48 = vadd.f32 %v4914_v28, %v2165_v35 }
 0x1fb   : > { %2256 = vst [vmem:[%s4919_s18 + $0x78] sm:$0xff] %v2174_v55 }
 0x1fc   : > { %2254 = vst [vmem:[%s4919_s18 + $0x68] sm:$0xff] %v2166_v48 }
 0x206   : > { %v2948_v51 = vpop.f32.mrb[12].mxu1 }
 0x207   : > { %v2235_v6 = vadd.f32 %v2948_v51, %v4914_v28  ;;  %v2226_v36 = vpop.f32.mrb[13].mxu1 }
 0x208   : > { %v2227_v40 = vadd.f32 %v4914_v28, %v2226_v36  ;;  %v2949_v20 = vpop.f32.mrb[14].mxu1 }
 0x209   : > { %2271 = vst [vmem:[%s4919_s18 + $0xf0] sm:$0xff] %v2235_v6  ;;  %v2238_v50 = vadd.f32 %v2949_v20, %v4914_v28  ;;  %v2229_v56 = vpop.f32.mrb[15].mxu1 }
 0x20a   : > { %2269 = vst [vmem:[%s4919_s18 + $0xe0] sm:$0xff] %v2227_v40  ;;  %v2230_v59 = vadd.f32 %v4914_v28, %v2229_v56 }
 0x20b   : > { %2272 = vst [vmem:[%s4919_s18 + $0xf8] sm:$0xff] %v2238_v50 }
 0x20c   : > { %2270 = vst [vmem:[%s4919_s18 + $0xe8] sm:$0xff] %v2230_v59 }
 0x20d PF: > { %s15_s20 = sadd.s32 1, %s3011_s20   ;;  %s5004_s18 = smov %s3007_s19 }
 0x20e   : > { %p12_p6 = scmp.ge.s32.totalorder %s15_s20, 4   ;;  %s5005_s19 = smov %s5007_s21 }
 0x210   :  { %14 = sbr.rel (!%p12_p6) target bundleno = 2 (0x2), region = 95 }

</bundles_post_ra>
